<compile_context>
chip_gen: v6e
topology: v6e:2x2x1
jax: 0.10.0
libtpu: 0.0.40
codegen_flags: <defaults>
</compile_context>

<pallas_src>
import numpy as np
import jax
import jax.numpy as jnp
from jax import lax
from jax.experimental import pallas as pl
from jax.experimental.pallas import tpu as pltpu

# ------------------------- small synthetic config ---------------------------
B, T, H = 2, 16, 32                 # batch, seq, hidden_size
NUM_HEADS, HEAD_DIM = 4, 8          # num_attention_heads, head dim
INTERMEDIATE = 64                   # intermediate_size
NUM_LAYERS = 2                      # num_hidden_layers
CONV_K = 8                          # num_conv_pos_embeddings (even -> SamePad drops 1)
CONV_GROUPS = 4                     # num_conv_pos_embedding_groups
LN_EPS = 1e-5                       # layer_norm_eps
PAD = CONV_K // 2
BT = B * T                          # 32  (flattened batch*time)
HT = NUM_HEADS * T                  # 64  (head-stacked key rows, per batch)
KH = CONV_K * H                     # 256 (im2col contraction dim)
N_VEC, VEC_W = 10, INTERMEDIATE     # packed per-layer vector slab
F32 = jnp.float32
BF16 = jnp.bfloat16                 # MXU operand dtype
SCALE = HEAD_DIM ** -0.5

# Host-precomputed, loop-invariant per-head lane selector:
# row hk = n*T + tk keeps only head n's HEAD_DIM lane block.
_HEAD_MASK_NP = (np.arange(HT)[:, None] // T ==
                 np.arange(H)[None, :] // HEAD_DIM).astype(np.float32)


def _gelu(x):
    # exact (erf) GELU, matching ACT2FN["gelu"] in transformers
    return 0.5 * x * (1.0 + lax.erf(x * 0.7071067811865476))


def _layer_norm(h, g, b):
    mu = jnp.mean(h, axis=-1, keepdims=True)
    c = h - mu
    var = jnp.mean(c * c, axis=-1, keepdims=True)
    return c * lax.rsqrt(var + LN_EPS) * g + b


# --------------------- positional-conv prologue kernel ----------------------
def pos_conv_kernel(x_unf_ref, x_ref, conv_w_ref, conv_b_ref, o_ref):
    # one im2col matmul per batch block; residual x is a separate f32 input
    conv = jnp.dot(x_unf_ref[...], conv_w_ref[...],
                   preferred_element_type=F32) + conv_b_ref[...]
    o_ref[...] = x_ref[...] + _gelu(conv)       # dropout = identity (eval)


# --------------------------- fused layer-stack kernel ------------------------
def encoder_layers_kernel(hs0_ref, hmask_ref, attw_ref, w1_ref, w2_ref,
                          vec_ref, fin_ref, o_ref, hs_ref):
    l = pl.program_id(1)

    @pl.when(l == 0)
    def _():
        hs_ref[...] = hs0_ref[...]              # seed per-batch resident state

    hs = hs_ref[...]                            # (T, H) f32, VMEM-resident

    vecs = vec_ref[0]                           # (N_VEC, VEC_W) f32, one DMA
    ln1_g, ln1_b = vecs[0:1, :H], vecs[1:2, :H]
    bq, bk = vecs[2:3, :H], vecs[3:4, :H]
    bv, bo = vecs[4:5, :H], vecs[5:6, :H]
    ln2_g, ln2_b = vecs[6:7, :H], vecs[7:8, :H]
    b2 = vecs[8:9, :H]
    b1 = vecs[9:10, :]                          # (1, INTERMEDIATE)

    # -------------------- pre-LN self attention --------------------
    h = _layer_norm(hs, ln1_g, ln1_b)
    hb = h.astype(BF16)
    q = (jnp.dot(hb, attw_ref[0, 0], preferred_element_type=F32) + bq) * SCALE
    k = jnp.dot(hb, attw_ref[0, 1], preferred_element_type=F32) + bk
    v = jnp.dot(hb, attw_ref[0, 2], preferred_element_type=F32) + bv

    hmask = hmask_ref[...]                                          # (HT, H) const
    k_wide = (jnp.tile(k, (NUM_HEADS, 1)) * hmask).astype(BF16)     # (HT, H)
    v_wide = (jnp.tile(v, (NUM_HEADS, 1)) * hmask).astype(BF16)     # (HT, H)

    # Transposed scores: row = (head, key token), col = query token, so the
    # per-(head, query) softmax is a segment reduction over sublanes.
    s_t = lax.dot_general(k_wide, q.astype(BF16), (((1,), (1,)), ((), ())),
                          preferred_element_type=F32)               # (HT, T)
    s3 = s_t.reshape(NUM_HEADS, T, T)                               # leading split only
    m = jnp.max(s3, axis=1, keepdims=True)                          # exact per-segment max
    e3 = jnp.exp(s3 - m)
    d = jnp.sum(e3, axis=1, keepdims=True)                          # exact f32 denom (no MXU)
    p_t = (e3 * pl.reciprocal(d, approx=True)).reshape(HT, T)       # (HT, T)
    ctx = lax.dot_general(p_t.astype(BF16), v_wide, (((0,), (0,)), ((), ())),
                          preferred_element_type=F32)               # (T, H)
    attn = jnp.dot(ctx.astype(BF16), attw_ref[0, 3],
                   preferred_element_type=F32) + bo
    hs = hs + attn

    # -------------------- pre-LN feed forward --------------------
    h2 = _layer_norm(hs, ln2_g, ln2_b)
    ff = _gelu(jnp.dot(h2.astype(BF16), w1_ref[0],
                       preferred_element_type=F32) + b1)
    hs = hs + jnp.dot(ff.astype(BF16), w2_ref[0],
                      preferred_element_type=F32) + b2

    hs_ref[...] = hs

    @pl.when(l == NUM_LAYERS - 1)
    def _():
        o_ref[...] = _layer_norm(hs, fin_ref[0:1, :], fin_ref[1:2, :])


# ------------------------------ wrapper --------------------------------------
@jax.jit
def forward(hidden_states, packed):
    # TODO(synk): attention_mask / feat_split_idx paths (data-dependent masking,
    # ragged per-sample pos-conv), training-time dropout/layerdrop and
    # output_hidden_states/attentions are not implemented (default inference path).

    # im2col of the (Conv1d padding = K//2, SamePad drops last) positional conv.
    xp = jnp.pad(hidden_states, ((0, 0), (PAD, PAD), (0, 0)))
    x_unf = jnp.concatenate([xp[:, k:k + T, :] for k in range(CONV_K)], axis=-1)
    x_unf = x_unf.reshape(BT, KH).astype(BF16)          # bf16 MXU operand
    x_flat = hidden_states.reshape(BT, H).astype(F32)   # f32 residual

    head_mask = jnp.asarray(_HEAD_MASK_NP)

    # --- prologue: positional conv embedding (per-batch parallel) ---
    hs0 = pl.pallas_call(
        pos_conv_kernel,
        out_shape=jax.ShapeDtypeStruct((BT, H), F32),
        grid=(B,),
        in_specs=[
            pl.BlockSpec((T, KH), lambda b: (b, 0)),
            pl.BlockSpec((T, H), lambda b: (b, 0)),
            pl.BlockSpec((KH, H), lambda b: (0, 0)),
            pl.BlockSpec((1, H), lambda b: (0, 0)),
        ],
        out_specs=pl.BlockSpec((T, H), lambda b: (b, 0)),
        compiler_params=pltpu.CompilerParams(
            dimension_semantics=("parallel",),
            vmem_limit_bytes=32 * 1024 * 1024),
    )(x_unf, x_flat, packed['conv_w'], packed['conv_b'])

    # --- fused layer stack: batch parallel, layer axis carries state ---
    out = pl.pallas_call(
        encoder_layers_kernel,
        out_shape=jax.ShapeDtypeStruct((BT, H), F32),
        grid=(B, NUM_LAYERS),
        in_specs=[
            pl.BlockSpec((T, H), lambda b, l: (b, 0)),                  # hs0 (fetched once per b)
            pl.BlockSpec((HT, H), lambda b, l: (0, 0)),                 # head mask (const)
            pl.BlockSpec((1, 4, H, H), lambda b, l: (l, 0, 0, 0)),      # packed q/k/v/o weights
            pl.BlockSpec((1, H, INTERMEDIATE), lambda b, l: (l, 0, 0)), # ff1 weight
            pl.BlockSpec((1, INTERMEDIATE, H), lambda b, l: (l, 0, 0)), # ff2 weight
            pl.BlockSpec((1, N_VEC, VEC_W), lambda b, l: (l, 0, 0)),    # packed LN/bias vectors
            pl.BlockSpec((2, H), lambda b, l: (0, 0)),                  # final LN (const)
        ],
        out_specs=pl.BlockSpec((T, H), lambda b, l: (b, 0)),
        scratch_shapes=[pltpu.VMEM((T, H), F32)],                       # resident hidden state
        compiler_params=pltpu.CompilerParams(
            dimension_semantics=("parallel", "arbitrary"),
            vmem_limit_bytes=32 * 1024 * 1024),
    )(hs0, head_mask, packed['attw'], packed['w1'], packed['w2'],
      packed['vec'], packed['fin'])
    return out.reshape(B, T, H)


def pack_params(params):
    """Host-side packing of per-layer weights/vectors into few large DMAs."""
    attw = jnp.stack([params['wq'], params['wk'], params['wv'], params['wo']],
                     axis=1).astype(BF16)                       # (L, 4, H, H)

    def row(name):                                              # (L,1,H) -> (L, VEC_W)
        v = params[name][:, 0, :]
        return jnp.pad(v, ((0, 0), (0, VEC_W - v.shape[-1])))

    vec = jnp.stack([row('ln1_g'), row('ln1_b'), row('bq'), row('bk'),
                     row('bv'), row('bo'), row('ln2_g'), row('ln2_b'),
                     row('b2'), params['b1'][:, 0, :]], axis=1)  # (L, 10, VEC_W)
    fin = jnp.concatenate([params['final_g'], params['final_b']], axis=0)  # (2, H)
    return dict(conv_w=params['conv_w'].reshape(KH, H).astype(BF16),
                conv_b=params['conv_b'],
                attw=attw,
                w1=params['w1'].astype(BF16),
                w2=params['w2'].astype(BF16),
                vec=vec, fin=fin)


# --------------------------- deterministic params ---------------------------
def init_params(key):
    keys = iter(jax.random.split(key, 64))

    def nrm(shape, scale=0.02):
        return scale * jax.random.normal(next(keys), shape, F32)

    # positional conv: torch weight_norm(Conv1d(H, H, K, groups=G), dim=2)
    gsz = H // CONV_GROUPS
    w_v = nrm((H, gsz, CONV_K), 0.1)                     # (out, in/groups, K)
    w_g = 1.0 + 0.1 * jax.random.normal(next(keys), (1, 1, CONV_K), F32)
    norm = jnp.sqrt(jnp.sum(w_v * w_v, axis=(0, 1), keepdims=True)) + 1e-12
    w_eff = np.array(w_g * w_v / norm)                   # weight_norm folded
    # fold groups into a block-diagonal dense weight: (K, H_in, H_out)
    # (kept dense at toy size; keep grouped blocks when H grows)
    wd = np.zeros((CONV_K, H, H), np.float32)
    for o in range(H):
        g = o // gsz
        wd[:, g * gsz:(g + 1) * gsz, o] = w_eff[o].T     # (K, gsz)
    conv_b = nrm((1, H))

    layers = []
    for _ in range(NUM_LAYERS):
        layers.append(dict(
            ln1_g=1.0 + nrm((1, H), 0.1), ln1_b=nrm((1, H), 0.1),
            wq=nrm((H, H)), bq=nrm((1, H)),
            wk=nrm((H, H)), bk=nrm((1, H)),
            wv=nrm((H, H)), bv=nrm((1, H)),
            wo=nrm((H, H)), bo=nrm((1, H)),
            ln2_g=1.0 + nrm((1, H), 0.1), ln2_b=nrm((1, H), 0.1),
            w1=nrm((H, INTERMEDIATE)), b1=nrm((1, INTERMEDIATE)),
            w2=nrm((INTERMEDIATE, H)), b2=nrm((1, H)),
        ))
    stacked = {k: jnp.stack([lp[k] for lp in layers], axis=0) for k in layers[0]}
    return dict(conv_w=jnp.asarray(wd), conv_b=conv_b,
                final_g=1.0 + nrm((1, H), 0.1), final_b=nrm((1, H), 0.1),
                **stacked)


# ----------------------------- pure-JAX reference ---------------------------
def ref_forward(x, params, mm_dtype=F32):
    """Reference with configurable matmul-operand dtype (f32 accumulation)."""
    def mm(a, w):
        return jnp.einsum('bti,io->bto', a.astype(mm_dtype), w.astype(mm_dtype),
                          preferred_element_type=F32)

    xp = jnp.pad(x, ((0, 0), (PAD, PAD), (0, 0)))
    conv = jnp.zeros((B, T, H), F32)
    for k in range(CONV_K):
        conv = conv + mm(xp[:, k:k + T, :], params['conv_w'][k])
    hs = x + _gelu(conv + params['conv_b'][0])

    for l in range(NUM_LAYERS):
        h = _layer_norm(hs, params['ln1_g'][l][0], params['ln1_b'][l][0])
        q = (mm(h, params['wq'][l]) + params['bq'][l][0]) * SCALE
        kk = mm(h, params['wk'][l]) + params['bk'][l][0]
        v = mm(h, params['wv'][l]) + params['bv'][l][0]
        q4 = q.reshape(B, T, NUM_HEADS, HEAD_DIM)
        k4 = kk.reshape(B, T, NUM_HEADS, HEAD_DIM)
        v4 = v.reshape(B, T, NUM_HEADS, HEAD_DIM)
        s = jnp.einsum('bqhd,bkhd->bhqk', q4.astype(mm_dtype), k4.astype(mm_dtype),
                       preferred_element_type=F32)
        pr = jax.nn.softmax(s, axis=-1)
        ctx = jnp.einsum('bhqk,bkhd->bqhd', pr.astype(mm_dtype), v4.astype(mm_dtype),
                         preferred_element_type=F32).reshape(B, T, H)
        hs = hs + mm(ctx, params['wo'][l]) + params['bo'][l][0]
        h2 = _layer_norm(hs, params['ln2_g'][l][0], params['ln2_b'][l][0])
        ff = _gelu(mm(h2, params['w1'][l]) + params['b1'][l][0])
        hs = hs + mm(ff, params['w2'][l]) + params['b2'][l][0]

    return _layer_norm(hs, params['final_g'][0], params['final_b'][0])


# --------------------------------- main --------------------------------------
if __name__ == "__main__":
    key = jax.random.PRNGKey(0)
    kx, kp = jax.random.split(key)
    x = jax.random.normal(kx, (B, T, H), F32)
    params = init_params(kp)
    packed = pack_params(params)

    out = jax.block_until_ready(forward(x, packed))
    assert out.shape == (B, T, H)

    # Tight check vs a reference that uses the same bf16 MXU-operand policy
    # (standard TPU mixed precision; f32 accumulation, f32 LN/softmax/GELU).
    ref_bf16 = ref_forward(x, params, mm_dtype=BF16)
    np.testing.assert_allclose(np.array(out), np.array(ref_bf16),
                               atol=2e-3, rtol=2e-3)
    # Loose sanity check vs the pure-f32 reference (bf16 operand rounding only).
    ref_f32 = ref_forward(x, params, mm_dtype=F32)
    np.testing.assert_allclose(np.array(out), np.array(ref_f32),
                               atol=3e-2, rtol=3e-2)
    print("KERNEL_OK")
</pallas_src>

<mosaic_0001>
module attributes {stable_mosaic.version = 11 : i64} {
  func.func @pos_conv_kernel(%arg0: i32, %arg1: memref<16x256xbf16, #tpu.memory_space<vmem>>, %arg2: memref<16x32xf32, #tpu.memory_space<vmem>>, %arg3: memref<256x32xbf16, #tpu.memory_space<vmem>>, %arg4: memref<1x32xf32, #tpu.memory_space<vmem>>, %arg5: memref<16x32xf32, #tpu.memory_space<vmem>>) attributes {dimension_semantics = [#tpu.dimension_semantics<parallel>], iteration_bounds = array<i64: 2>, scalar_prefetch = 0 : i64, scratch_operands = 0 : i64, tpu.core_type = #tpu.core_type<tc>, window_params = [{transform_indices = @transform_0, window_bounds = array<i64: 16, 256>}, {transform_indices = @transform_1, window_bounds = array<i64: 16, 32>}, {pipeline_mode = #tpu.pipeline_mode<synchronous>, transform_indices = @transform_2, window_bounds = array<i64: 256, 32>}, {pipeline_mode = #tpu.pipeline_mode<synchronous>, transform_indices = @transform_3, window_bounds = array<i64: 1, 32>}, {transform_indices = @transform_4, window_bounds = array<i64: 16, 32>}]} {
    %c0 = arith.constant 0 : index
    %c0_0 = arith.constant 0 : index
    %0 = vector.load %arg1[%c0, %c0_0] : memref<16x256xbf16, #tpu.memory_space<vmem>>, vector<16x256xbf16>
    %c0_1 = arith.constant 0 : index
    %c0_2 = arith.constant 0 : index
    %1 = vector.load %arg3[%c0_1, %c0_2] : memref<256x32xbf16, #tpu.memory_space<vmem>>, vector<256x32xbf16>
    %cst = arith.constant dense<0.000000e+00> : vector<16x32xf32>
    %2 = tpu.matmul %0, %1, %cst {dimension_numbers = #tpu.dot_dimension_numbers<[1], [0], [0], [1], [0, 0, 1, 1], [], []>} : vector<16x256xbf16>, vector<256x32xbf16>, vector<16x32xf32> -> vector<16x32xf32>
    %c0_3 = arith.constant 0 : index
    %c0_4 = arith.constant 0 : index
    %3 = vector.load %arg4[%c0_3, %c0_4] : memref<1x32xf32, #tpu.memory_space<vmem>>, vector<1x32xf32>
    %4 = vector.broadcast %3 : vector<1x32xf32> to vector<16x32xf32>
    %5 = arith.addf %2, %4 : vector<16x32xf32>
    %c0_5 = arith.constant 0 : index
    %c0_6 = arith.constant 0 : index
    %6 = vector.load %arg2[%c0_5, %c0_6] : memref<16x32xf32, #tpu.memory_space<vmem>>, vector<16x32xf32>
    %cst_7 = arith.constant 5.000000e-01 : f32
    %7 = vector.broadcast %cst_7 : f32 to vector<16x32xf32>
    %8 = arith.mulf %7, %5 : vector<16x32xf32>
    %cst_8 = arith.constant 0.707106769 : f32
    %9 = vector.broadcast %cst_8 : f32 to vector<16x32xf32>
    %10 = arith.mulf %5, %9 : vector<16x32xf32>
    %11 = math.erf %10 : vector<16x32xf32>
    %cst_9 = arith.constant 1.000000e+00 : f32
    %12 = vector.broadcast %cst_9 : f32 to vector<16x32xf32>
    %13 = arith.addf %12, %11 : vector<16x32xf32>
    %14 = arith.mulf %8, %13 : vector<16x32xf32>
    %15 = arith.addf %6, %14 : vector<16x32xf32>
    %c0_10 = arith.constant 0 : index
    %c0_11 = arith.constant 0 : index
    %16 = vector.load %arg5[%c0_10, %c0_11] : memref<16x32xf32, #tpu.memory_space<vmem>>, vector<16x32xf32>
    tpu.vector_store %arg5[%c0_10, %c0_11], %15 {strides = array<i32>} : memref<16x32xf32, #tpu.memory_space<vmem>>, vector<16x32xf32>,
    return
  }
  func.func @transform_0(%arg0: i32) -> (i32, i32) {
    %c0_i32 = arith.constant 0 : i32
    %c0_i32_0 = arith.constant 0 : i32
    return %arg0, %c0_i32 : i32, i32
  }
  func.func @transform_1(%arg0: i32) -> (i32, i32) {
    %c0_i32 = arith.constant 0 : i32
    %c0_i32_0 = arith.constant 0 : i32
    return %arg0, %c0_i32 : i32, i32
  }
  func.func @transform_2(%arg0: i32) -> (i32, i32) {
    %c0_i32 = arith.constant 0 : i32
    %c0_i32_0 = arith.constant 0 : i32
    %c0_i32_1 = arith.constant 0 : i32
    return %c0_i32, %c0_i32_0 : i32, i32
  }
  func.func @transform_3(%arg0: i32) -> (i32, i32) {
    %c0_i32 = arith.constant 0 : i32
    %c0_i32_0 = arith.constant 0 : i32
    %c0_i32_1 = arith.constant 0 : i32
    return %c0_i32, %c0_i32_0 : i32, i32
  }
  func.func @transform_4(%arg0: i32) -> (i32, i32) {
    %c0_i32 = arith.constant 0 : i32
    %c0_i32_0 = arith.constant 0 : i32
    return %arg0, %c0_i32 : i32, i32
  }
}

module attributes {stable_mosaic.version = 11 : i64} {
  func.func @encoder_layers_kernel(%arg0: i32, %arg1: i32, %arg2: memref<16x32xf32, #tpu.memory_space<vmem>>, %arg3: memref<64x32xf32, #tpu.memory_space<vmem>>, %arg4: memref<1x4x32x32xbf16, #tpu.memory_space<vmem>>, %arg5: memref<1x32x64xbf16, #tpu.memory_space<vmem>>, %arg6: memref<1x64x32xbf16, #tpu.memory_space<vmem>>, %arg7: memref<1x10x64xf32, #tpu.memory_space<vmem>>, %arg8: memref<2x32xf32, #tpu.memory_space<vmem>>, %arg9: memref<16x32xf32, #tpu.memory_space<vmem>>, %arg10: memref<16x32xf32, #tpu.memory_space<vmem>>) attributes {dimension_semantics = [#tpu.dimension_semantics<parallel>, #tpu.dimension_semantics<arbitrary>], iteration_bounds = array<i64: 2, 2>, scalar_prefetch = 0 : i64, scratch_operands = 1 : i64, tpu.core_type = #tpu.core_type<tc>, window_params = [{transform_indices = @transform_0, window_bounds = array<i64: 16, 32>}, {pipeline_mode = #tpu.pipeline_mode<synchronous>, transform_indices = @transform_1, window_bounds = array<i64: 64, 32>}, {transform_indices = @transform_2, window_bounds = array<i64: 1, 4, 32, 32>}, {transform_indices = @transform_3, window_bounds = array<i64: 1, 32, 64>}, {transform_indices = @transform_4, window_bounds = array<i64: 1, 64, 32>}, {transform_indices = @transform_5, window_bounds = array<i64: 1, 10, 64>}, {pipeline_mode = #tpu.pipeline_mode<synchronous>, transform_indices = @transform_6, window_bounds = array<i64: 2, 32>}, {transform_indices = @transform_7, window_bounds = array<i64: 16, 32>}]} {
    %c0_i32 = arith.constant 0 : i32
    %0 = arith.cmpi eq, %arg1, %c0_i32 : i32
    %1 = arith.extui %0 : i1 to i32
    %c0_i32_0 = arith.constant 0 : i32
    %2 = arith.cmpi ne, %1, %c0_i32_0 : i32
    scf.if %2 {
      %c0_52 = arith.constant 0 : index
      %c0_53 = arith.constant 0 : index
      %129 = vector.load %arg2[%c0_52, %c0_53] : memref<16x32xf32, #tpu.memory_space<vmem>>, vector<16x32xf32>
      %c0_54 = arith.constant 0 : index
      %c0_55 = arith.constant 0 : index
      %130 = vector.load %arg10[%c0_54, %c0_55] : memref<16x32xf32, #tpu.memory_space<vmem>>, vector<16x32xf32>
      tpu.vector_store %arg10[%c0_54, %c0_55], %129 {strides = array<i32>} : memref<16x32xf32, #tpu.memory_space<vmem>>, vector<16x32xf32>,
    } else {
    }
    %c0 = arith.constant 0 : index
    %c0_1 = arith.constant 0 : index
    %3 = vector.load %arg10[%c0, %c0_1] : memref<16x32xf32, #tpu.memory_space<vmem>>, vector<16x32xf32>
    %c0_2 = arith.constant 0 : index
    %c0_3 = arith.constant 0 : index
    %c0_4 = arith.constant 0 : index
    %4 = vector.load %arg7[%c0_2, %c0_3, %c0_4] : memref<1x10x64xf32, #tpu.memory_space<vmem>>, vector<1x10x64xf32>
    %5 = vector.shape_cast %4 : vector<1x10x64xf32> to vector<10x64xf32>
    %6 = vector.extract_strided_slice %5 {offsets = [0, 0], sizes = [1, 32], strides = [1, 1]} : vector<10x64xf32> to vector<1x32xf32>
    %7 = vector.extract_strided_slice %5 {offsets = [1, 0], sizes = [1, 32], strides = [1, 1]} : vector<10x64xf32> to vector<1x32xf32>
    %8 = vector.extract_strided_slice %5 {offsets = [2, 0], sizes = [1, 32], strides = [1, 1]} : vector<10x64xf32> to vector<1x32xf32>
    %9 = vector.extract_strided_slice %5 {offsets = [3, 0], sizes = [1, 32], strides = [1, 1]} : vector<10x64xf32> to vector<1x32xf32>
    %10 = vector.extract_strided_slice %5 {offsets = [4, 0], sizes = [1, 32], strides = [1, 1]} : vector<10x64xf32> to vector<1x32xf32>
    %11 = vector.extract_strided_slice %5 {offsets = [5, 0], sizes = [1, 32], strides = [1, 1]} : vector<10x64xf32> to vector<1x32xf32>
    %12 = vector.extract_strided_slice %5 {offsets = [6, 0], sizes = [1, 32], strides = [1, 1]} : vector<10x64xf32> to vector<1x32xf32>
    %13 = vector.extract_strided_slice %5 {offsets = [7, 0], sizes = [1, 32], strides = [1, 1]} : vector<10x64xf32> to vector<1x32xf32>
    %14 = vector.extract_strided_slice %5 {offsets = [8, 0], sizes = [1, 32], strides = [1, 1]} : vector<10x64xf32> to vector<1x32xf32>
    %15 = vector.extract_strided_slice %5 {offsets = [9, 0], sizes = [1, 64], strides = [1, 1]} : vector<10x64xf32> to vector<1x64xf32>
    %cst = arith.constant dense<0.000000e+00> : vector<16xf32>
    %16 = vector.multi_reduction <add>, %3, %cst [1] : vector<16x32xf32> to vector<16xf32>
    %17 = vector.shape_cast %16 : vector<16xf32> to vector<16x1xf32>
    %cst_5 = arith.constant 3.200000e+01 : f32
    %18 = vector.broadcast %cst_5 : f32 to vector<16x1xf32>
    %19 = arith.divf %17, %18 : vector<16x1xf32>
    %20 = vector.broadcast %19 : vector<16x1xf32> to vector<16x32xf32>
    %21 = arith.subf %3, %20 : vector<16x32xf32>
    %22 = arith.mulf %21, %21 : vector<16x32xf32>
    %cst_6 = arith.constant dense<0.000000e+00> : vector<16xf32>
    %23 = vector.multi_reduction <add>, %22, %cst_6 [1] : vector<16x32xf32> to vector<16xf32>
    %24 = vector.shape_cast %23 : vector<16xf32> to vector<16x1xf32>
    %cst_7 = arith.constant 3.200000e+01 : f32
    %25 = vector.broadcast %cst_7 : f32 to vector<16x1xf32>
    %26 = arith.divf %24, %25 : vector<16x1xf32>
    %cst_8 = arith.constant 9.99999974E-6 : f32
    %27 = vector.broadcast %cst_8 : f32 to vector<16x1xf32>
    %28 = arith.addf %26, %27 : vector<16x1xf32>
    %29 = math.rsqrt %28 : vector<16x1xf32>
    %30 = vector.broadcast %29 : vector<16x1xf32> to vector<16x32xf32>
    %31 = arith.mulf %21, %30 : vector<16x32xf32>
    %32 = vector.broadcast %6 : vector<1x32xf32> to vector<16x32xf32>
    %33 = arith.mulf %31, %32 : vector<16x32xf32>
    %34 = vector.broadcast %7 : vector<1x32xf32> to vector<16x32xf32>
    %35 = arith.addf %33, %34 : vector<16x32xf32>
    %36 = arith.truncf %35 : vector<16x32xf32> to vector<16x32xbf16>
    %c0_9 = arith.constant 0 : index
    %c0_10 = arith.constant 0 : index
    %c0_11 = arith.constant 0 : index
    %c0_12 = arith.constant 0 : index
    %37 = vector.load %arg4[%c0_9, %c0_10, %c0_11, %c0_12] : memref<1x4x32x32xbf16, #tpu.memory_space<vmem>>, vector<1x1x32x32xbf16>
    %38 = vector.shape_cast %37 : vector<1x1x32x32xbf16> to vector<32x32xbf16>
    %cst_13 = arith.constant dense<0.000000e+00> : vector<16x32xf32>
    %39 = tpu.matmul %36, %38, %cst_13 {dimension_numbers = #tpu.dot_dimension_numbers<[1], [0], [0], [1], [0, 0, 1, 1], [], []>} : vector<16x32xbf16>, vector<32x32xbf16>, vector<16x32xf32> -> vector<16x32xf32>
    %40 = vector.broadcast %8 : vector<1x32xf32> to vector<16x32xf32>
    %41 = arith.addf %39, %40 : vector<16x32xf32>
    %cst_14 = arith.constant 0.353553385 : f32
    %42 = vector.broadcast %cst_14 : f32 to vector<16x32xf32>
    %43 = arith.mulf %41, %42 : vector<16x32xf32>
    %c0_15 = arith.constant 0 : index
    %c1 = arith.constant 1 : index
    %c0_16 = arith.constant 0 : index
    %c0_17 = arith.constant 0 : index
    %44 = vector.load %arg4[%c0_15, %c1, %c0_16, %c0_17] : memref<1x4x32x32xbf16, #tpu.memory_space<vmem>>, vector<1x1x32x32xbf16>
    %45 = vector.shape_cast %44 : vector<1x1x32x32xbf16> to vector<32x32xbf16>
    %cst_18 = arith.constant dense<0.000000e+00> : vector<16x32xf32>
    %46 = tpu.matmul %36, %45, %cst_18 {dimension_numbers = #tpu.dot_dimension_numbers<[1], [0], [0], [1], [0, 0, 1, 1], [], []>} : vector<16x32xbf16>, vector<32x32xbf16>, vector<16x32xf32> -> vector<16x32xf32>
    %47 = vector.broadcast %9 : vector<1x32xf32> to vector<16x32xf32>
    %48 = arith.addf %46, %47 : vector<16x32xf32>
    %c0_19 = arith.constant 0 : index
    %c2 = arith.constant 2 : index
    %c0_20 = arith.constant 0 : index
    %c0_21 = arith.constant 0 : index
    %49 = vector.load %arg4[%c0_19, %c2, %c0_20, %c0_21] : memref<1x4x32x32xbf16, #tpu.memory_space<vmem>>, vector<1x1x32x32xbf16>
    %50 = vector.shape_cast %49 : vector<1x1x32x32xbf16> to vector<32x32xbf16>
    %cst_22 = arith.constant dense<0.000000e+00> : vector<16x32xf32>
    %51 = tpu.matmul %36, %50, %cst_22 {dimension_numbers = #tpu.dot_dimension_numbers<[1], [0], [0], [1], [0, 0, 1, 1], [], []>} : vector<16x32xbf16>, vector<32x32xbf16>, vector<16x32xf32> -> vector<16x32xf32>
    %52 = vector.broadcast %10 : vector<1x32xf32> to vector<16x32xf32>
    %53 = arith.addf %51, %52 : vector<16x32xf32>
    %c0_23 = arith.constant 0 : index
    %c0_24 = arith.constant 0 : index
    %54 = vector.load %arg3[%c0_23, %c0_24] : memref<64x32xf32, #tpu.memory_space<vmem>>, vector<64x32xf32>
    %55 = tpu.concatenate %48, %48, %48, %48 in 0 : vector<16x32xf32>, vector<16x32xf32>, vector<16x32xf32>, vector<16x32xf32> -> vector<64x32xf32>
    %56 = arith.mulf %55, %54 : vector<64x32xf32>
    %57 = arith.truncf %56 : vector<64x32xf32> to vector<64x32xbf16>
    %58 = tpu.concatenate %53, %53, %53, %53 in 0 : vector<16x32xf32>, vector<16x32xf32>, vector<16x32xf32>, vector<16x32xf32> -> vector<64x32xf32>
    %59 = arith.mulf %58, %54 : vector<64x32xf32>
    %60 = arith.truncf %59 : vector<64x32xf32> to vector<64x32xbf16>
    %61 = arith.truncf %43 : vector<16x32xf32> to vector<16x32xbf16>
    %cst_25 = arith.constant dense<0.000000e+00> : vector<64x16xf32>
    %62 = tpu.matmul %57, %61, %cst_25 {dimension_numbers = #tpu.dot_dimension_numbers<[1], [1], [0], [0], [0, 0, 1, 0], [], []>} : vector<64x32xbf16>, vector<16x32xbf16>, vector<64x16xf32> -> vector<64x16xf32>
    %63 = vector.shape_cast %62 : vector<64x16xf32> to vector<4x16x16xf32>
    %cst_26 = arith.constant dense<0xFF800000> : vector<4x16xf32>
    %64 = vector.multi_reduction <maximumf>, %63, %cst_26 [1] : vector<4x16x16xf32> to vector<4x16xf32>
    %65 = vector.shape_cast %64 : vector<4x16xf32> to vector<4x1x16xf32>
    %66 = vector.broadcast %65 : vector<4x1x16xf32> to vector<4x16x16xf32>
    %67 = arith.subf %63, %66 : vector<4x16x16xf32>
    %68 = math.exp %67 : vector<4x16x16xf32>
    %cst_27 = arith.constant dense<0.000000e+00> : vector<4x16xf32>
    %69 = vector.multi_reduction <add>, %68, %cst_27 [1] : vector<4x16x16xf32> to vector<4x16xf32>
    %70 = vector.shape_cast %69 : vector<4x16xf32> to vector<4x1x16xf32>
    %71 = tpu.reciprocal %70 {approx = true} : vector<4x1x16xf32> -> vector<4x1x16xf32>
    %72 = vector.broadcast %71 : vector<4x1x16xf32> to vector<4x16x16xf32>
    %73 = arith.mulf %68, %72 : vector<4x16x16xf32>
    %74 = vector.shape_cast %73 : vector<4x16x16xf32> to vector<64x16xf32>
    %75 = arith.truncf %74 : vector<64x16xf32> to vector<64x16xbf16>
    %cst_28 = arith.constant dense<0.000000e+00> : vector<16x32xf32>
    %76 = tpu.matmul %75, %60, %cst_28 {dimension_numbers = #tpu.dot_dimension_numbers<[0], [0], [1], [1], [0, 1, 1, 1], [], []>} : vector<64x16xbf16>, vector<64x32xbf16>, vector<16x32xf32> -> vector<16x32xf32>
    %77 = arith.truncf %76 : vector<16x32xf32> to vector<16x32xbf16>
    %c0_29 = arith.constant 0 : index
    %c3 = arith.constant 3 : index
    %c0_30 = arith.constant 0 : index
    %c0_31 = arith.constant 0 : index
    %78 = vector.load %arg4[%c0_29, %c3, %c0_30, %c0_31] : memref<1x4x32x32xbf16, #tpu.memory_space<vmem>>, vector<1x1x32x32xbf16>
    %79 = vector.shape_cast %78 : vector<1x1x32x32xbf16> to vector<32x32xbf16>
    %cst_32 = arith.constant dense<0.000000e+00> : vector<16x32xf32>
    %80 = tpu.matmul %77, %79, %cst_32 {dimension_numbers = #tpu.dot_dimension_numbers<[1], [0], [0], [1], [0, 0, 1, 1], [], []>} : vector<16x32xbf16>, vector<32x32xbf16>, vector<16x32xf32> -> vector<16x32xf32>
    %81 = vector.broadcast %11 : vector<1x32xf32> to vector<16x32xf32>
    %82 = arith.addf %80, %81 : vector<16x32xf32>
    %83 = arith.addf %3, %82 : vector<16x32xf32>
    %cst_33 = arith.constant dense<0.000000e+00> : vector<16xf32>
    %84 = vector.multi_reduction <add>, %83, %cst_33 [1] : vector<16x32xf32> to vector<16xf32>
    %85 = vector.shape_cast %84 : vector<16xf32> to vector<16x1xf32>
    %cst_34 = arith.constant 3.200000e+01 : f32
    %86 = vector.broadcast %cst_34 : f32 to vector<16x1xf32>
    %87 = arith.divf %85, %86 : vector<16x1xf32>
    %88 = vector.broadcast %87 : vector<16x1xf32> to vector<16x32xf32>
    %89 = arith.subf %83, %88 : vector<16x32xf32>
    %90 = arith.mulf %89, %89 : vector<16x32xf32>
    %cst_35 = arith.constant dense<0.000000e+00> : vector<16xf32>
    %91 = vector.multi_reduction <add>, %90, %cst_35 [1] : vector<16x32xf32> to vector<16xf32>
    %92 = vector.shape_cast %91 : vector<16xf32> to vector<16x1xf32>
    %cst_36 = arith.constant 3.200000e+01 : f32
    %93 = vector.broadcast %cst_36 : f32 to vector<16x1xf32>
    %94 = arith.divf %92, %93 : vector<16x1xf32>
    %cst_37 = arith.constant 9.99999974E-6 : f32
    %95 = vector.broadcast %cst_37 : f32 to vector<16x1xf32>
    %96 = arith.addf %94, %95 : vector<16x1xf32>
    %97 = math.rsqrt %96 : vector<16x1xf32>
    %98 = vector.broadcast %97 : vector<16x1xf32> to vector<16x32xf32>
    %99 = arith.mulf %89, %98 : vector<16x32xf32>
    %100 = vector.broadcast %12 : vector<1x32xf32> to vector<16x32xf32>
    %101 = arith.mulf %99, %100 : vector<16x32xf32>
    %102 = vector.broadcast %13 : vector<1x32xf32> to vector<16x32xf32>
    %103 = arith.addf %101, %102 : vector<16x32xf32>
    %104 = arith.truncf %103 : vector<16x32xf32> to vector<16x32xbf16>
    %c0_38 = arith.constant 0 : index
    %c0_39 = arith.constant 0 : index
    %c0_40 = arith.constant 0 : index
    %105 = vector.load %arg5[%c0_38, %c0_39, %c0_40] : memref<1x32x64xbf16, #tpu.memory_space<vmem>>, vector<1x32x64xbf16>
    %106 = vector.shape_cast %105 : vector<1x32x64xbf16> to vector<32x64xbf16>
    %cst_41 = arith.constant dense<0.000000e+00> : vector<16x64xf32>
    %107 = tpu.matmul %104, %106, %cst_41 {dimension_numbers = #tpu.dot_dimension_numbers<[1], [0], [0], [1], [0, 0, 1, 1], [], []>} : vector<16x32xbf16>, vector<32x64xbf16>, vector<16x64xf32> -> vector<16x64xf32>
    %108 = vector.broadcast %15 : vector<1x64xf32> to vector<16x64xf32>
    %109 = arith.addf %107, %108 : vector<16x64xf32>
    %cst_42 = arith.constant 5.000000e-01 : f32
    %110 = vector.broadcast %cst_42 : f32 to vector<16x64xf32>
    %111 = arith.mulf %110, %109 : vector<16x64xf32>
    %cst_43 = arith.constant 0.707106769 : f32
    %112 = vector.broadcast %cst_43 : f32 to vector<16x64xf32>
    %113 = arith.mulf %109, %112 : vector<16x64xf32>
    %114 = math.erf %113 : vector<16x64xf32>
    %cst_44 = arith.constant 1.000000e+00 : f32
    %115 = vector.broadcast %cst_44 : f32 to vector<16x64xf32>
    %116 = arith.addf %115, %114 : vector<16x64xf32>
    %117 = arith.mulf %111, %116 : vector<16x64xf32>
    %118 = arith.truncf %117 : vector<16x64xf32> to vector<16x64xbf16>
    %c0_45 = arith.constant 0 : index
    %c0_46 = arith.constant 0 : index
    %c0_47 = arith.constant 0 : index
    %119 = vector.load %arg6[%c0_45, %c0_46, %c0_47] : memref<1x64x32xbf16, #tpu.memory_space<vmem>>, vector<1x64x32xbf16>
    %120 = vector.shape_cast %119 : vector<1x64x32xbf16> to vector<64x32xbf16>
    %cst_48 = arith.constant dense<0.000000e+00> : vector<16x32xf32>
    %121 = tpu.matmul %118, %120, %cst_48 {dimension_numbers = #tpu.dot_dimension_numbers<[1], [0], [0], [1], [0, 0, 1, 1], [], []>} : vector<16x64xbf16>, vector<64x32xbf16>, vector<16x32xf32> -> vector<16x32xf32>
    %122 = arith.addf %83, %121 : vector<16x32xf32>
    %123 = vector.broadcast %14 : vector<1x32xf32> to vector<16x32xf32>
    %124 = arith.addf %122, %123 : vector<16x32xf32>
    %c0_49 = arith.constant 0 : index
    %c0_50 = arith.constant 0 : index
    %125 = vector.load %arg10[%c0_49, %c0_50] : memref<16x32xf32, #tpu.memory_space<vmem>>, vector<16x32xf32>
    tpu.vector_store %arg10[%c0_49, %c0_50], %124 {strides = array<i32>} : memref<16x32xf32, #tpu.memory_space<vmem>>, vector<16x32xf32>,
    %c1_i32 = arith.constant 1 : i32
    %126 = arith.cmpi eq, %arg1, %c1_i32 : i32
    %127 = arith.extui %126 : i1 to i32
    %c0_i32_51 = arith.constant 0 : i32
    %128 = arith.cmpi ne, %127, %c0_i32_51 : i32
    scf.if %128 {
      %c0_52 = arith.constant 0 : index
      %c0_53 = arith.constant 0 : index
      %129 = vector.load %arg8[%c0_52, %c0_53] : memref<2x32xf32, #tpu.memory_space<vmem>>, vector<1x32xf32>
      %c1_54 = arith.constant 1 : index
      %c0_55 = arith.constant 0 : index
      %130 = vector.load %arg8[%c1_54, %c0_55] : memref<2x32xf32, #tpu.memory_space<vmem>>, vector<1x32xf32>
      %cst_56 = arith.constant dense<0.000000e+00> : vector<16xf32>
      %131 = vector.multi_reduction <add>, %124, %cst_56 [1] : vector<16x32xf32> to vector<16xf32>
      %132 = vector.shape_cast %131 : vector<16xf32> to vector<16x1xf32>
      %cst_57 = arith.constant 3.200000e+01 : f32
      %133 = vector.broadcast %cst_57 : f32 to vector<16x1xf32>
      %134 = arith.divf %132, %133 : vector<16x1xf32>
      %135 = vector.broadcast %134 : vector<16x1xf32> to vector<16x32xf32>
      %136 = arith.subf %124, %135 : vector<16x32xf32>
      %137 = arith.mulf %136, %136 : vector<16x32xf32>
      %cst_58 = arith.constant dense<0.000000e+00> : vector<16xf32>
      %138 = vector.multi_reduction <add>, %137, %cst_58 [1] : vector<16x32xf32> to vector<16xf32>
      %139 = vector.shape_cast %138 : vector<16xf32> to vector<16x1xf32>
      %cst_59 = arith.constant 3.200000e+01 : f32
      %140 = vector.broadcast %cst_59 : f32 to vector<16x1xf32>
      %141 = arith.divf %139, %140 : vector<16x1xf32>
      %cst_60 = arith.constant 9.99999974E-6 : f32
      %142 = vector.broadcast %cst_60 : f32 to vector<16x1xf32>
      %143 = arith.addf %141, %142 : vector<16x1xf32>
      %144 = math.rsqrt %143 : vector<16x1xf32>
      %145 = vector.broadcast %144 : vector<16x1xf32> to vector<16x32xf32>
      %146 = arith.mulf %136, %145 : vector<16x32xf32>
      %147 = vector.broadcast %129 : vector<1x32xf32> to vector<16x32xf32>
      %148 = arith.mulf %146, %147 : vector<16x32xf32>
      %149 = vector.broadcast %130 : vector<1x32xf32> to vector<16x32xf32>
      %150 = arith.addf %148, %149 : vector<16x32xf32>
      %c0_61 = arith.constant 0 : index
      %c0_62 = arith.constant 0 : index
      %151 = vector.load %arg9[%c0_61, %c0_62] : memref<16x32xf32, #tpu.memory_space<vmem>>, vector<16x32xf32>
      tpu.vector_store %arg9[%c0_61, %c0_62], %150 {strides = array<i32>} : memref<16x32xf32, #tpu.memory_space<vmem>>, vector<16x32xf32>,
    } else {
    }
    return
  }
  func.func @transform_0(%arg0: i32, %arg1: i32) -> (i32, i32) {
    %c0_i32 = arith.constant 0 : i32
    %c0_i32_0 = arith.constant 0 : i32
    return %arg0, %c0_i32 : i32, i32
  }
  func.func @transform_1(%arg0: i32, %arg1: i32) -> (i32, i32) {
    %c0_i32 = arith.constant 0 : i32
    %c0_i32_0 = arith.constant 0 : i32
    %c0_i32_1 = arith.constant 0 : i32
    return %c0_i32, %c0_i32_0 : i32, i32
  }
  func.func @transform_2(%arg0: i32, %arg1: i32) -> (i32, i32, i32, i32) {
    %c0_i32 = arith.constant 0 : i32
    %c0_i32_0 = arith.constant 0 : i32
    %c0_i32_1 = arith.constant 0 : i32
    %c0_i32_2 = arith.constant 0 : i32
    return %arg1, %c0_i32, %c0_i32_0, %c0_i32_1 : i32, i32, i32, i32
  }
  func.func @transform_3(%arg0: i32, %arg1: i32) -> (i32, i32, i32) {
    %c0_i32 = arith.constant 0 : i32
    %c0_i32_0 = arith.constant 0 : i32
    %c0_i32_1 = arith.constant 0 : i32
    return %arg1, %c0_i32, %c0_i32_0 : i32, i32, i32
  }
  func.func @transform_4(%arg0: i32, %arg1: i32) -> (i32, i32, i32) {
    %c0_i32 = arith.constant 0 : i32
    %c0_i32_0 = arith.constant 0 : i32
    %c0_i32_1 = arith.constant 0 : i32
    return %arg1, %c0_i32, %c0_i32_0 : i32, i32, i32
  }
  func.func @transform_5(%arg0: i32, %arg1: i32) -> (i32, i32, i32) {
    %c0_i32 = arith.constant 0 : i32
    %c0_i32_0 = arith.constant 0 : i32
    %c0_i32_1 = arith.constant 0 : i32
    return %arg1, %c0_i32, %c0_i32_0 : i32, i32, i32
  }
  func.func @transform_6(%arg0: i32, %arg1: i32) -> (i32, i32) {
    %c0_i32 = arith.constant 0 : i32
    %c0_i32_0 = arith.constant 0 : i32
    %c0_i32_1 = arith.constant 0 : i32
    return %c0_i32, %c0_i32_0 : i32, i32
  }
  func.func @transform_7(%arg0: i32, %arg1: i32) -> (i32, i32) {
    %c0_i32 = arith.constant 0 : i32
    %c0_i32_0 = arith.constant 0 : i32
    return %arg0, %c0_i32 : i32, i32
  }
}

</mosaic_0001>

<bundles_post_ra>
// kernel: forward.2
= control target key start
LH: loop header
LB: loop body
LE: loop exit
PB: predicated region body
PF: predicated region fallthrough
CT: control target
= control target key end

     0   :  { %s620_s15 = smov 0   ;;  %s696_s0 = inlined_call_operand.vmem [shape: bf16[32,256], index: 0, kind: input, shape index: {}]   ;;  %s697_s1 = inlined_call_operand.vmem [shape: f32[32,32], index: 1, kind: input, shape index: {}]   ;;  %s698_s2 = inlined_call_operand.vmem [shape: bf16[256,32], index: 2, kind: input, shape index: {}]   ;;  %s699_s3 = inlined_call_operand.vmem [shape: f32[1,32], index: 3, kind: input, shape index: {}]   ;;  %s700_s4 = inlined_call_operand.vmem [shape: f32[32,32], index: 4, kind: output, shape index: {}]  }
   0x1 LB: > { %s500_s16 = sadd.s32 4294967295, %s593_s15   ;;  %p504_p0 = scmp.ge.s32.totalorder %s593_s15, 1  ;;  %s593_s15 = sphi %s620_s15, %s14_s15  }
   0x2   : > { %p175_p1 = scmp.lt.s32.totalorder %s593_s15, 3 }
   0x4   : > { %p176_p2 = pnand %p504_p0, %p175_p1 }
   0x5   : > { %s505_s19 = sshll.u32 (!%p176_p2), %s500_s16, 1 }
   0x6   : > { %179 = sbr.rel (%p176_p2) target bundleno = 270 (0x10e), region = 36  ;;  %p208_p3 = scmp.lt.s32.totalorder (!%p176_p2), %s505_s19, 3 }
   0xb   : > { %v564_v0 = vld [vmem:[%s698_s2 + $0x78] sm:$0xff]   ;;  %v566_v2 = vld [vmem:[%s698_s2 + $0x70] sm:$0xff]   ;;  %v568_v4 = vld [vmem:[%s698_s2 + $0x68] sm:$0xff]   ;;  %s702_s19 = smov (!%p208_p3, %s505_s19), 3  ;;  %vm429_vm0 = vcmask 261120  }
   0xc   : > { %v565_v1 = vld [vmem:[%s698_s2 + $0x38] sm:$0xff]   ;;  %534 = vmatprep.subr.bf16.mxu0 %v564_v0  ;;  %v567_v3 = vld [vmem:[%s698_s2 + $0x30] sm:$0xff]   ;;  %v569_v5 = vld [vmem:[%s698_s2 + $0x28] sm:$0xff]   ;;  %s652_s8 = sshll.u32 %s702_s19, 3 }
   0xd   : > { %535 = vmatpush3.bf16.msra.mxu0 %v565_v1  ;;  %v570_v6 = vld [vmem:[%s698_s2 + $0x60] sm:$0xff]   ;;  %v572_v8 = vld [vmem:[%s698_s2 + $0x58] sm:$0xff]   ;;  %s212_s13 = scalar_lea.vmem %s696_s0, %s652_s8  ;;  %v574_v10 = vld [vmem:[%s698_s2 + $0x50] sm:$0xff]   ;;  %s218_s7 = scalar_lea.vmem %s697_s1, %s652_s8 }
   0xe   : > { %536 = vmatprep.subr.bf16.mxu0 %v566_v2  ;;  %v571_v7 = vld [vmem:[%s698_s2 + $0x20] sm:$0xff]   ;;  %v573_v9 = vld [vmem:[%s698_s2 + $0x18] sm:$0xff]   ;;  %v575_v12 = vld [vmem:[%s698_s2 + $0x10] sm:$0xff]   ;;  %s224_s11 = scalar_lea.vmem %s700_s4, %s652_s8 }
   0xf   : > { %v582_v11 = vld [vmem:[%s212_s13 + $0x4] ss:$8 sps:$4 sm:$0xff]   ;;  %v580_v17 = vld [vmem:[%s212_s13] ss:$8 sps:$4 sm:$0xff]  }
  0x10   : > { %406 = vmatprep.mubr.bf16.mxu0 %v582_v11  ;;  %v576_v13 = vld [vmem:[%s698_s2 + $0x48] sm:$0xff]   ;;  %v578_v15 = vld [vmem:[%s698_s2 + $0x40] sm:$0xff]  }
  0x11   : > { %537 = vmatpush3.bf16.msra.mxu0 %v567_v3  ;;  %v577_v14 = vld [vmem:[%s698_s2 + $0x8] sm:$0xff]   ;;  %v579_v16 = vld [vmem:[%s698_s2] sm:$0xff]  }
  0x12   : > { %538 = vmatprep.subr.bf16.mxu0 %v568_v4  ;;  %v512_v19 = vld [vmem:[%s699_s3] ss:$0 sm:$0xff]  ;;  %v416_v38 = vld [vmem:[%s218_s7 + $0x8] sm:$0xff] }
  0x13   : > { %v415_v32 = vld [vmem:[%s218_s7] sm:$0xff] }
  0x15   : > { %539 = vmatpush3.bf16.msra.mxu0 %v569_v5 }
  0x16   : > { %540 = vmatprep.subr.bf16.mxu0 %v570_v6 }
  0x19   : > { %541 = vmatpush3.bf16.msra.mxu0 %v571_v7 }
  0x1a   : > { %542 = vmatprep.subr.bf16.mxu0 %v572_v8 }
  0x1d   : > { %543 = vmatpush3.bf16.msra.mxu0 %v573_v9 }
  0x1e   : > { %544 = vmatprep.subr.bf16.mxu0 %v574_v10 }
  0x21   : > { %545 = vmatpush3.bf16.msra.mxu0 %v575_v12 }
  0x22   : > { %546 = vmatprep.subr.bf16.mxu0 %v576_v13 }
  0x25   : > { %547 = vmatpush3.bf16.msra.mxu0 %v577_v14 }
  0x26   : > { %548 = vmatprep.subr.bf16.mxu0 %v578_v15 }
  0x29   : > { %549 = vmatpush3.bf16.msra.mxu0 %v579_v16 }
  0x2c   : > { %407 = vmatmul.mubr.bf16.vlgmr.msra.gmra.mxu0 %v580_v17 }
  0xec   : > { %v550_v18 = vpop.f32.mrf.mxu0 }
  0xee   : > { %v551_v20 = vpop.f32.mrf.mxu0 }
  0xef   : > { %v552_v21 = vadd.f32 %v551_v20, %v550_v18 }
  0xf0   : > { %v553_v22 = vpop.f32.mrf.mxu0 }
  0xf1   : > { %v409_v23 = vadd.f32 %v552_v21, %v512_v19 }
  0xf2   : > { %v554_v24 = vpop.f32.mrf.mxu0 }
  0xf3   : > { %v419_v25 = vmul.f32 0.70710677, %v409_v23  ;;  %v555_v26 = vadd.f32 %v554_v24, %v553_v22  ;;  %v417_v30 = vmul.f32 0.5, %v409_v23 }
  0xf5   : > { %583 = verf.f32 %v419_v25  ;;  %v412_v27 = vadd.f32 %v555_v26, %v512_v19 }
  0xf7   : > { %v420_v28 = vmul.f32 0.70710677, %v412_v27  ;;  %v418_v36 = vmul.f32 0.5, %v412_v27 }
  0xf9   : > { %585 = verf.f32 %v420_v28 }
 0x102   : > { %v584_v29 = vpop.eup %583 }
 0x103   : > { %v423_v31 = vadd.f32 1.0, %v584_v29 }
 0x105   : > { %v425_v33 = vmul.f32 %v423_v31, %v417_v30 }
 0x106   : > { %v586_v34 = vpop.eup %585 }
 0x107   : > { %v427_v35 = vadd.f32 %v425_v33, %v415_v32  ;;  %v424_v37 = vadd.f32 1.0, %v586_v34 }
 0x109   : > { %430 = vst.msk [vmem:[%s224_s11] sm:$0xff] %vm429_vm0, %v427_v35  ;;  %v426_v39 = vmul.f32 %v424_v37, %v418_v36 }
 0x10b   : > { %v428_v40 = vadd.f32 %v426_v39, %v416_v38 }
 0x10d   : > { %431 = vst.msk [vmem:[%s224_s11 + $0x8] sm:$0xff] %vm429_vm0, %v428_v40 }
 0x10e PF: > { %s14_s15 = sadd.s32 1, %s593_s15  }
 0x10f   : > { %p11_p4 = scmp.ge.s32.totalorder %s14_s15, 4  }
 0x111   :  { %13 = sbr.rel (!%p11_p4) target bundleno = 1 (0x1), region = 69 }

// kernel: forward.3
= control target key start
LH: loop header
LB: loop body
LE: loop exit
PB: predicated region body
PF: predicated region fallthrough
CT: control target
= control target key end

     0   :  { %12 = vsyncpa [#allocation4], 0  ;;  %s2131_s0 = inlined_call_operand.vmem [shape: f32[32,32], index: 0, kind: input, shape index: {}]   ;;  %s2132_s1 = inlined_call_operand.vmem [shape: f32[64,32], index: 1, kind: input, shape index: {}]   ;;  %s2133_s2 = inlined_call_operand.vmem [shape: bf16[2,4,32,32], index: 2, kind: input, shape index: {}]   ;;  %s2134_s3 = inlined_call_operand.vmem [shape: bf16[2,32,64], index: 3, kind: input, shape index: {}]   ;;  %s2135_s4 = inlined_call_operand.vmem [shape: bf16[2,64,32], index: 4, kind: input, shape index: {}]   ;;  %s2136_s5 = inlined_call_operand.vmem [shape: f32[2,10,64], index: 5, kind: input, shape index: {}]   ;;  %s2137_s6 = inlined_call_operand.vmem [shape: f32[2,32], index: 6, kind: input, shape index: {}]   ;;  %s2138_s7 = inlined_call_operand.hbm [shape: f32[32,32], index: 7, kind: output, shape index: {}]  }
   0x1   :  { %14 = vsyncpa [#allocation4 + $0x1], 0  ;;  %s1794_s24 = smov 0   ;;  %s1796_s25 = smov 0  }
   0x2   :  { %s1798_s26 = smov 0   ;;  %s1800_s27 = smov 0  }
   0x3   :  { %s1802_s28 = smov 0   ;;  %s1804_s29 = smov 0  }
   0x4   :  { %s1806_s30 = smov 0   ;;  %s1808_s8 = smov 0  }
   0x5 LB: > { %2146 = sst [smem:[#allocation6_spill]] %s1719_s24  ;;  %s1353_s9 = sadd.s32 4294967295, %s1747_s8   ;;  %s1747_s8 = sphi %s1808_s8, %s20_s8   ;;  %s1743_s30 = sphi %s1806_s30, %s2164_s30   ;;  %s1739_s29 = sphi %s1804_s29, %s2163_s29   ;;  %s1735_s28 = sphi %s1802_s28, %s2162_s28   ;;  %s1731_s27 = sphi %s1800_s27, %s2161_s27   ;;  %s1727_s26 = sphi %s1798_s26, %s2160_s26   ;;  %s1723_s25 = sphi %s1796_s25, %s2166_s25   ;;  %s1719_s24 = sphi %s1794_s24, %s2165_s24  }
   0x6   : > { %2147 = sst [smem:[#allocation7_spill]] %s1727_s26  ;;  %s1354_s10 = sadd.s32 4294967294, %s1747_s8  }
   0x7   : > { %2148 = sst [smem:[#allocation8_spill]] %s1739_s29  ;;  %s29_s11 = sadd.s32 1, %s1739_s29 }
   0x8   : > { %2149 = sst [smem:[#allocation9_spill]] %s1743_s30  ;;  %p30_p0 = scmp.ge.s32.totalorder %s29_s11, 2 }
   0x9   : > { %s32_s12 = sadd.s32 1, %s1743_s30  ;;  %p221_p1 = scmp.ne.s32.totalorder %s1727_s26, %s1723_s25 }
   0xa   : > { %p222_p2 = scmp.eq.s32.totalorder %s1353_s9, 3  ;;  %s2168_s11 = smov (%p30_p0, %s29_s11), 0 }
   0xb   : > { %2150 = sst [smem:[#allocation10_spill]] %s2168_s11  ;;  %s2170_s12 = smov (!%p30_p0, %s32_s12), %s1743_s30 }
   0xc   : > { %p1843_p3 = por %p222_p2, %p221_p1  ;;  %p227_p4 = scmp.ne.s32.totalorder %s1723_s25, %s1719_s24 }
   0xd   : > { %p34_p5 = scmp.ge.s32.totalorder %s2170_s12, 2  ;;  %p228_p6 = scmp.eq.s32.totalorder %s1354_s10, 3 }
   0xe   : > { %p1357_p7 = scmp.ge.s32.totalorder %s1747_s8, 1  ;;  %p293_p8 = scmp.lt.s32.totalorder %s1747_s8, 5 }
   0xf   : > { %s2172_s12 = smov (%p34_p5, %s2170_s12), 0  ;;  %p1853_p9 = por %p228_p6, %p227_p4 }
  0x10   : > { %2152 = sst [smem:[#allocation11_spill]] %s2172_s12  ;;  %p294_p10 = pnand %p1357_p7, %p293_p8 }
  0x11   : > { %s2153_s14 = scalar_select %p1853_p9, 1, 0 }
  0x12   : > { %s208_s15 = ssub.s32 %s1743_s30, %s2172_s12  ;;  %s211_s16 = sadd.s32 1, %s1727_s26 }
  0x13   : > { %2154 = sst [smem:[#allocation12_spill]] %s2153_s14  ;;  %p209_p11 = scmp.eq.s32.totalorder %s208_s15, 0 }
  0x14   : > { %297 = sbr.rel (%p294_p10) target bundleno = 2403 (0x963), region = 48  ;;  %s2142_s18 = sand.u32 (!%p294_p10), 1, %s1723_s25  }
  0x15   : > { %s1861_s17 = scalar_select %p209_p11, %s1727_s26, %s211_s16  }
  0x16   : > { %s1359_s19 = sshll.u32 (!%p294_p10), %s1735_s28, 1  ;;  %s1358_s20 = sshll.u32 (!%p294_p10), %s2142_s18, 4 }
  0x17   : > { %2155 = sst [smem:[#allocation13_spill]] %s1861_s17  ;;  %p346_p12 = scmp.lt.s32.totalorder (!%p294_p10), %s1359_s19, 3 }
  0x18   : > { %p351_p13 = scmp.lt.s32.totalorder (!%p294_p10), %s1731_s27, 1  ;;  %s1892_s12 = scalar_lea.vmem (!%p294_p10), [#allocation3], %s1358_s20 }
  0x19   : > { %s2174_s19 = smov (!%p346_p12, %s1359_s19), 3  ;;  %p1369_p0 = scmp.ne.s32.totalorder %s1731_s27, 0 }
  0x1a   : > { %s352_s21 = scalar_select %p351_p13, %s1731_s27, 1 }
  0x1b   : > { %s1360_s22 = sshll.u32 %s2174_s19, 3  ;;  %376 = sbr.rel (%p1369_p0) target bundleno = 34 (0x22), region = 52 }
  0x1c   : > { %s349_s10 = scalar_lea.vmem %s2131_s0, %s1360_s22  ;;  %s1415_s15 = sshll.u32 %s352_s21, 6 }
  0x1d   : > { %s1875_s11 = scalar_lea.vmem %s2133_s2, %s1415_s15  ;;  %s1416_s30 = sshll.u32 %s352_s21, 4 }
  0x1e   : > { %s1880_s18 = scalar_lea.vmem %s2134_s3, %s1416_s30  ;;  %s1417_s26 = sshll.u32 %s352_s21, 5 }
  0x1f   : > { %s1885_s19 = scalar_lea.vmem %s2135_s4, %s1417_s26  ;;  %s1890_s9 = scalar_lea.vmem %s2136_s5, %s1416_s30 }
  0x20   : > { %v377_v0 = vld [vmem:[%s349_s10] sm:$0xff]  ;;  %vm379_vm0 = vcmask 261120   ;;  %v378_v1 = vld [vmem:[%s349_s10 + $0x8] sm:$0xff] }
  0x21   : > { %380 = vst.msk [vmem:[#allocation2] sm:$0xff] %vm379_vm0, %v377_v0  ;;  %381 = vst.msk [vmem:[#allocation2 + $0x8] sm:$0xff] %vm379_vm0, %v378_v1 }
  0x22 PF: > { %vm386_vm1 = vcmask 261120   ;;  %v1601_v16 = vld [vmem:[%s1875_s11 + $0x8] sm:$0xff]   ;;  %v1602_v17 = vld [vmem:[%s1875_s11 + $0x18] sm:$0xff]   ;;  %v1749_v18 = vmov 0.0   ;;  %v1603_v19 = vld [vmem:[%s1875_s11] sm:$0xff]   ;;  %vm1750_vm2 = vmmov 0   ;;  %v414_v27 = vlaneseq }
  0x23   : > { %1450 = vmatprep.subr.bf16.mxu0 %v1749_v18  ;;  %1458 = vmatprep.subr.bf16.mxu1 %v1749_v18  ;;  %v1604_v20 = vld [vmem:[%s1875_s11 + $0x10] sm:$0xff]   ;;  %v1924_v30 = vld [vmem:[%s1890_s9] sm:$0xff]  ;;  %v1605_v42 = vld [vmem:[%s1875_s11 + $0x28] sm:$0xff]   ;;  %vm730_vm3 = vcmask 130048   ;;  %vm859_vm4 = vcmask 523264   ;;  %p1407_p1 = scmp.ne.s32.totalorder %s1731_s27, 1 }
  0x24   : > { %1451 = vmatpush3.bf16.msra.mxu0 %v1601_v16  ;;  %1459 = vmatpush3.bf16.msra.mxu1 %v1602_v17  ;;  %v1920_v28 = vshrl.u32 %v414_v27, 7  ;;  %v1606_v44 = vld [vmem:[%s1875_s11 + $0x20] sm:$0xff]   ;;  %v618_v59 = vld [vmem:[%s2132_s1 + $0x8] sm:$0xff]  ;;  %v619_v16 = vld [vmem:[%s2132_s1 + $0x10] sm:$0xff] }
  0x25   : > { %1452 = vmatprep.subr.bf16.mxu0 %v1749_v18  ;;  %1460 = vmatprep.subr.bf16.mxu1 %v1749_v18  ;;  %v617_v56 = vld [vmem:[%s2132_s1] sm:$0xff] }
  0x26   : > { %1454 = vmatprep.mubr.msk.bf16.mxu0 %vm1750_vm2, %v1749_v18  ;;  %1462 = vmatprep.mubr.msk.bf16.mxu1 %vm1750_vm2, %v1749_v18  ;;  %v416_v29 = vsub.s32 0, %v1920_v28  ;;  %v422_v34 = vsub.s32 1, %v1920_v28  ;;  %v433_v45 = vsub.s32 2, %v1920_v28  ;;  %v500_v46 = vsub.s32 3, %v1920_v28 }
  0x27   : > { %v562_v53 = vsub.s32 4, %v1920_v28 }
  0x28   : > { %v1895_v2 = vld [vmem:[#allocation2] sm:$0xff]  ;;  %v1897_v3 = vld [vmem:[#allocation2 + $0x8] sm:$0xff]  ;;  %1453 = vmatpush3.bf16.msra.mxu0 %v1603_v19  ;;  %1461 = vmatpush3.bf16.msra.mxu1 %v1604_v20  ;;  %v417_v33 = vrot.slane %v1924_v30, %v416_v29  ;;  %v423_v38 = vrot.slane %v1924_v30, %v422_v34  ;;  %v434_v47 = vrot.slane %v1924_v30, %v433_v45  ;;  %v623_v20 = vld [vmem:[%s2132_s1 + $0x30] sm:$0xff] }
  0x29   : > { %v387_v4 = vsel %vm386_vm1, %v1895_v2, 0.0  ;;  %v390_v5 = vsel %vm386_vm1, %v1897_v3, 0.0  ;;  %1466 = vmatprep.subr.bf16.mxu0 %v1749_v18  ;;  %v501_v48 = vrot.slane %v1924_v30, %v500_v46  ;;  %v563_v0 = vrot.slane %v1924_v30, %v562_v53  ;;  %v621_v19 = vld [vmem:[%s2132_s1 + $0x20] sm:$0xff] }
  0x2a   : > { %388 = vadd.xlane.f32.xlu0 %v387_v4 }
  0x2e   : > { %391 = vadd.xlane.f32.xlu0 %v390_v5 }
  0xb3   : > { %v389_v6 = vpop.xlane.xlu0 %388 }
  0xb4   : > { %v394_v7 = vmul.f32 0.03125, %v389_v6 }
  0xb6   : > { %v396_v8 = vsub.f32 %v1895_v2, %v394_v7 }
  0xb7   : > { %v392_v9 = vpop.xlane.xlu0 %391 }
  0xb8   : > { %v395_v10 = vmul.f32 0.03125, %v392_v9  ;;  %v398_v11 = vmul.f32 %v396_v8, %v396_v8 }
  0xba   : > { %v397_v12 = vsub.f32 %v1897_v3, %v395_v10  ;;  %v400_v13 = vsel %vm386_vm1, %v398_v11, 0.0  ;;  %v620_v11 = vld [vmem:[%s2132_s1 + $0x18] sm:$0xff] }
  0xbb   : > { %401 = vadd.xlane.f32.xlu1 %v400_v13  ;;  %v622_v13 = vld [vmem:[%s2132_s1 + $0x28] sm:$0xff] }
  0xbc   : > { %v399_v14 = vmul.f32 %v397_v12, %v397_v12 }
  0xbe   : > { %v403_v15 = vsel %vm386_vm1, %v399_v14, 0.0 }
  0xbf   : > { %404 = vadd.xlane.f32.xlu1 %v403_v15 }
 0x144   : > { %v402_v21 = vpop.xlane.xlu1 %401 }
 0x145   : > { %v406_v22 = vmul.f32 0.03125, %v402_v21  ;;  %v624_v21 = vld [vmem:[%s2132_s1 + $0x38] sm:$0xff] }
 0x147   : > { %v408_v23 = vadd.f32 1e-05, %v406_v22 }
 0x148   : > { %v405_v24 = vpop.xlane.xlu1 %404 }
 0x149   : > { %1615 = vrsqrt.f32 %v408_v23  ;;  %v407_v25 = vmul.f32 0.03125, %v405_v24 }
 0x14b   : > { %v409_v26 = vadd.f32 1e-05, %v407_v25 }
 0x14d   : > { %1617 = vrsqrt.f32 %v409_v26 }
 0x156   : > { %v1616_v31 = vpop.eup %1615 }
 0x157   : > { %v412_v32 = vmul.f32 %v1616_v31, %v396_v8 }
 0x159   : > { %v418_v37 = vmul.f32 %v417_v33, %v412_v32 }
 0x15a   : > { %v1618_v35 = vpop.eup %1617 }
 0x15b   : > { %v413_v36 = vmul.f32 %v1618_v35, %v397_v12  ;;  %v424_v40 = vadd.f32 %v423_v38, %v418_v37 }
 0x15d   : > { %v419_v39 = vmul.f32 %v417_v33, %v413_v36 }
 0x15f   : > { %v425_v41 = vadd.f32 %v423_v38, %v419_v39 }
 0x161   : > { %v426_v43 = vpack.c.bf16 %v425_v41, %v424_v40 }
 0x163   : > { %1455 = vmatmul.mubr.msk.bf16.vlgmr.msra.gmra.mxu0 %vm386_vm1, %v426_v43  ;;  %1463 = vmatmul.mubr.msk.bf16.vlgmr.msra.gmra.mxu1 %vm386_vm1, %v426_v43 }
 0x164   : > { %1467 = vmatpush3.bf16.msra.mxu0 %v1605_v42  ;;  %1470 = vmatprep.mubr.msk.bf16.mxu0 %vm1750_vm2, %v1749_v18 }
 0x165   : > { %1468 = vmatprep.subr.bf16.mxu0 %v1749_v18 }
 0x168   : > { %1469 = vmatpush3.bf16.msra.mxu0 %v1606_v44 }
 0x169   : > { %1484 = vmatprep.subr.bf16.mxu0 %v1749_v18 }
 0x16b   : > { %1471 = vmatmul.mubr.msk.bf16.vlgmr.msra.gmra.mxu0 %vm386_vm1, %v426_v43 }
 0x16c   : > { %1492 = vmatprep.mubr.msk.bf16.mxu0 %vm1750_vm2, %v1749_v18 }
 0x223   : > { %v484_v49 = vpop.f32.mrf.mxu0  ;;  %v548_v50 = vpop.f32.mrf.mxu1 }
 0x224   : > { %v485_v54 = vadd.f32 %v484_v49, %v434_v47  ;;  %v549_v55 = vadd.f32 %v548_v50, %v501_v48 }
 0x225   : > { %v1456_v51 = vpop.f32.mrf.mxu0  ;;  %v1464_v52 = vpop.f32.mrf.mxu1 }
 0x226   : > { %v491_v1 = vmul.f32 0.35355338, %v485_v54  ;;  %v625_v4 = vmul.f32 %v617_v56, %v549_v55  ;;  %v627_v27 = vmul.f32 %v619_v16, %v549_v55  ;;  %v629_v31 = vmul.f32 %v621_v19, %v549_v55 }
 0x227   : > { %v487_v57 = vpop.f32.mrf.mxu0  ;;  %v551_v58 = vpop.f32.mrf.mxu1  ;;  %v631_v42 = vmul.f32 %v623_v20, %v549_v55 }
 0x228   : > { %v488_v60 = vadd.f32 %v487_v57, %v434_v47  ;;  %v552_v61 = vadd.f32 %v551_v58, %v501_v48 }
 0x229   : > { %v1457_v62 = vpop.f32.mrf.mxu0  ;;  %v1465_v63 = vpop.f32.mrf.mxu1 }
 0x22a   : > { %v492_v5 = vmul.f32 0.35355338, %v488_v60  ;;  %v626_v6 = vmul.f32 %v618_v59, %v552_v61  ;;  %v628_v22 = vmul.f32 %v620_v11, %v552_v61  ;;  %v630_v24 = vmul.f32 %v622_v13, %v552_v61 }
 0x22b   : > { %v610_v7 = vpop.f32.mrf.mxu0  ;;  %v632_v40 = vmul.f32 %v624_v21, %v552_v61 }
 0x22c   : > { %v649_v8 = vpack.c.bf16 %v492_v5, %v491_v1  ;;  %v633_v9 = vpack.c.bf16 %v626_v6, %v625_v4  ;;  %v611_v12 = vadd.f32 %v610_v7, %v563_v0  ;;  %v634_v35 = vpack.c.bf16 %v628_v22, %v627_v27 }
 0x22d   : > { %v1472_v10 = vpop.f32.mrf.mxu0  ;;  %v635_v37 = vpack.c.bf16 %v630_v24, %v629_v31  ;;  %v636_v45 = vpack.c.bf16 %v632_v40, %v631_v42 }
 0x22e   : > { %1524 = vmatprep.subr.msk.bf16.mxu1 %vm386_vm1, %v649_v8  ;;  %1476 = vmatprep.mubr.msk.bf16.mxu1 %vm386_vm1, %v633_v9  ;;  %v663_v15 = vsel %vm386_vm1, %v649_v8, 0  ;;  %v643_v25 = vmul.f32 %v623_v20, %v611_v12  ;;  %v641_v36 = vmul.f32 %v621_v19, %v611_v12  ;;  %v639_v41 = vmul.f32 %v619_v16, %v611_v12 }
 0x22f   : > { %v613_v14 = vpop.f32.mrf.mxu0  ;;  %1475 = vmatpush3.bf16.xpose.msra.mxu1 %v663_v15  ;;  %v637_v46 = vmul.f32 %v617_v56, %v611_v12 }
 0x230   : > { %v614_v17 = vadd.f32 %v613_v14, %v563_v0  ;;  %1496 = vmatprep.subr.bf16.mxu1 %v1749_v18 }
 0x231   : > { %v1473_v23 = vpop.f32.mrf.mxu0 }
 0x232   : > { %v644_v26 = vmul.f32 %v624_v21, %v614_v17  ;;  %v642_v32 = vmul.f32 %v622_v13, %v614_v17  ;;  %v640_v38 = vmul.f32 %v620_v11, %v614_v17  ;;  %v638_v43 = vmul.f32 %v618_v59, %v614_v17 }
 0x234   : > { %v648_v33 = vpack.c.bf16 %v644_v26, %v643_v25  ;;  %v647_v39 = vpack.c.bf16 %v642_v32, %v641_v36  ;;  %v646_v44 = vpack.c.bf16 %v640_v38, %v639_v41  ;;  %v645_v47 = vpack.c.bf16 %v638_v43, %v637_v46 }
 0x236   : > { %1485 = vmatpush3.bf16.msra.mxu0 %v648_v33  ;;  %1477 = vmatmul.mubr.msk.bf16.vlgmr.msra.gmra.mxu1 %vm386_vm1, %v634_v35 }
 0x237   : > { %1486 = vmatprep.subr.bf16.mxu0 %v1749_v18  ;;  %1480 = vmatprep.mubr.msk.bf16.mxu1 %vm386_vm1, %v635_v37 }
 0x23a   : > { %1487 = vmatpush3.bf16.msra.mxu0 %v647_v39 }
 0x23b   : > { %1488 = vmatprep.subr.bf16.mxu0 %v1749_v18 }
 0x23e   : > { %1489 = vmatpush3.bf16.msra.mxu0 %v646_v44  ;;  %1481 = vmatmul.mubr.msk.bf16.gmra.mxu1 %vm386_vm1, %v636_v45 }
 0x23f   : > { %1490 = vmatprep.subr.bf16.mxu0 %v1749_v18  ;;  %1500 = vmatprep.mubr.msk.bf16.mxu1 %vm1750_vm2, %v1749_v18 }
 0x242   : > { %1491 = vmatpush3.bf16.msra.mxu0 %v645_v47 }
 0x243   : > { %1504 = vmatprep.subr.bf16.mxu0 %v1749_v18 }
 0x2f6   : > { %v1478_v48 = vpop.f32.mrf.mxu1 }
 0x2f7   : > { %v740_v51 = vsel %vm730_vm3, %v1478_v48, -inf }
 0x2f8   : > { %v699_v49 = vpop.f32.mrf.mxu1 }
 0x2f9   : > { %v731_v55 = vsel %vm730_vm3, %v699_v49, -inf }
 0x2fa   : > { %v1479_v50 = vpop.f32.mrf.mxu1 }
 0x2fb   : > { %v741_v52 = vsel %vm730_vm3, %v1479_v50, -inf }
 0x2fc   : > { %v742_v53 = vmax.f32 %v740_v51, %v741_v52  ;;  %v702_v54 = vpop.f32.mrf.mxu1 }
 0x2fd   : > { %v732_v56 = vsel %vm730_vm3, %v702_v54, -inf }
 0x2fe   : > { %v743_v57 = vrot.slane %v742_v53, 4  ;;  %v733_v58 = vmax.f32 %v731_v55, %v732_v56  ;;  %v1482_v59 = vpop.f32.mrf.mxu1 }
 0x2ff   : > { %v758_v4 = vsel %vm730_vm3, %v1482_v59, -inf }
 0x300   : > { %v744_v60 = vmax.f32 %v742_v53, %v743_v57  ;;  %v734_v61 = vrot.slane %v733_v58, 4  ;;  %v715_v62 = vpop.f32.mrf.mxu1 }
 0x301   : > { %v749_v10 = vsel %vm730_vm3, %v715_v62, -inf }
 0x302   : > { %v745_v63 = vrot.slane %v744_v60, 2  ;;  %v735_v0 = vmax.f32 %v733_v58, %v734_v61  ;;  %v1483_v1 = vpop.f32.mrf.mxu1 }
 0x303   : > { %v759_v5 = vsel %vm730_vm3, %v1483_v1, -inf }
 0x304   : > { %v746_v6 = vmax.f32 %v744_v60, %v745_v63  ;;  %v736_v7 = vrot.slane %v735_v0, 2  ;;  %v760_v8 = vmax.f32 %v758_v4, %v759_v5  ;;  %v718_v9 = vpop.f32.mrf.mxu1  ;;  %v1607_v5 = vld [vmem:[%s1875_s11 + $0x38] sm:$0xff]  }
 0x305   : > { %v750_v11 = vsel %vm730_vm3, %v718_v9, -inf  ;;  %1497 = vmatpush3.bf16.msra.mxu1 %v1607_v5 }
 0x306   : > { %v747_v12 = vrot.slane %v746_v6, 1  ;;  %v737_v13 = vmax.f32 %v735_v0, %v736_v7  ;;  %v761_v14 = vrot.slane %v760_v8, 4  ;;  %v751_v15 = vmax.f32 %v749_v10, %v750_v11  ;;  %1498 = vmatprep.subr.bf16.mxu1 %v1749_v18 }
 0x308   : > { %v748_v16 = vmax.f32 %v746_v6, %v747_v12  ;;  %v738_v17 = vrot.slane %v737_v13, 1  ;;  %v762_v19 = vmax.f32 %v760_v8, %v761_v14  ;;  %v752_v20 = vrot.slane %v751_v15, 4 }
 0x30a   : > { %v769_v21 = vsub.f32 %v1478_v48, %v748_v16  ;;  %v770_v22 = vsub.f32 %v1479_v50, %v748_v16  ;;  %v739_v23 = vmax.f32 %v737_v13, %v738_v17  ;;  %v763_v24 = vrot.slane %v762_v19, 2 }
 0x30b   : > { %v753_v25 = vmax.f32 %v751_v15, %v752_v20 }
 0x30c   : > { %v779_v26 = vmul.f32 1.442695, %v769_v21  ;;  %v781_v27 = vmul.f32 1.442695, %v770_v22  ;;  %v767_v31 = vsub.f32 %v699_v49, %v739_v23  ;;  %v768_v32 = vsub.f32 %v702_v54, %v739_v23 }
 0x30d   : > { %v764_v33 = vmax.f32 %v762_v19, %v763_v24  ;;  %v754_v35 = vrot.slane %v753_v25, 2 }
 0x30e   : > { %1619 = vpow2.f32 %v779_v26  ;;  %v775_v36 = vmul.f32 1.442695, %v767_v31  ;;  %v777_v37 = vmul.f32 1.442695, %v768_v32 }
 0x30f   : > { %1621 = vpow2.f32 %v781_v27  ;;  %v765_v38 = vrot.slane %v764_v33, 1  ;;  %v755_v39 = vmax.f32 %v753_v25, %v754_v35 }
 0x310   : > { %1623 = vpow2.f32 %v775_v36 }
 0x311   : > { %1625 = vpow2.f32 %v777_v37  ;;  %v766_v40 = vmax.f32 %v764_v33, %v765_v38  ;;  %v756_v41 = vrot.slane %v755_v39, 1 }
 0x313   : > { %v773_v42 = vsub.f32 %v1482_v59, %v766_v40  ;;  %v774_v43 = vsub.f32 %v1483_v1, %v766_v40  ;;  %v757_v44 = vmax.f32 %v755_v39, %v756_v41 }
 0x315   : > { %v787_v45 = vmul.f32 1.442695, %v773_v42  ;;  %v789_v46 = vmul.f32 1.442695, %v774_v43  ;;  %v771_v47 = vsub.f32 %v715_v62, %v757_v44  ;;  %v772_v48 = vsub.f32 %v718_v9, %v757_v44 }
 0x317   : > { %1627 = vpow2.f32 %v787_v45  ;;  %v783_v49 = vmul.f32 1.442695, %v771_v47  ;;  %v785_v50 = vmul.f32 1.442695, %v772_v48 }
 0x318   : > { %1629 = vpow2.f32 %v789_v46 }
 0x319   : > { %1631 = vpow2.f32 %v783_v49 }
 0x31a   : > { %1633 = vpow2.f32 %v785_v50 }
 0x31b   : > { %v1620_v51 = vpop.eup %1619 }
 0x31c   : > { %v1622_v52 = vpop.eup %1621  ;;  %v800_v53 = vsel %vm730_vm3, %v1620_v51, 0.0 }
 0x31d   : > { %v1624_v54 = vpop.eup %1623  ;;  %v801_v55 = vsel %vm730_vm3, %v1622_v52, 0.0 }
 0x31e   : > { %v1626_v56 = vpop.eup %1625  ;;  %v802_v57 = vadd.f32 %v801_v55, %v800_v53  ;;  %v791_v58 = vsel %vm730_vm3, %v1624_v54, 0.0 }
 0x31f   : > { %v792_v59 = vsel %vm730_vm3, %v1626_v56, 0.0 }
 0x320   : > { %v803_v60 = vrot.slane %v802_v57, 4  ;;  %v793_v61 = vadd.f32 %v792_v59, %v791_v58 }
 0x322   : > { %v804_v62 = vadd.f32 %v803_v60, %v802_v57  ;;  %v794_v63 = vrot.slane %v793_v61, 4 }
 0x324   : > { %v1628_v0 = vpop.eup %1627  ;;  %v805_v1 = vrot.slane %v804_v62, 2  ;;  %v795_v4 = vadd.f32 %v794_v63, %v793_v61 }
 0x325   : > { %v1630_v6 = vpop.eup %1629  ;;  %v818_v7 = vsel %vm730_vm3, %v1628_v0, 0.0 }
 0x326   : > { %v1632_v8 = vpop.eup %1631  ;;  %v806_v9 = vadd.f32 %v805_v1, %v804_v62  ;;  %v796_v10 = vrot.slane %v795_v4, 2  ;;  %v819_v11 = vsel %vm730_vm3, %v1630_v6, 0.0  ;;  %v912_v62 = vsub.s32 5, %v1920_v28 }
 0x327   : > { %v1634_v12 = vpop.eup %1633  ;;  %v820_v13 = vadd.f32 %v819_v11, %v818_v7  ;;  %v809_v14 = vsel %vm730_vm3, %v1632_v8, 0.0 }
 0x328   : > { %v810_v15 = vsel %vm730_vm3, %v1634_v12, 0.0  ;;  %v797_v16 = vadd.f32 %v796_v10, %v795_v4  ;;  %v807_v17 = vrot.slane %v806_v9, 1  ;;  %v913_v63 = vrot.slane %v1924_v30, %v912_v62 }
 0x329   : > { %v821_v19 = vrot.slane %v820_v13, 4  ;;  %v811_v20 = vadd.f32 %v810_v15, %v809_v14 }
 0x32a   : > { %v798_v21 = vrot.slane %v797_v16, 1  ;;  %v808_v22 = vadd.f32 %v807_v17, %v806_v9 }
 0x32b   : > { %v822_v23 = vadd.f32 %v821_v19, %v820_v13  ;;  %v812_v24 = vrot.slane %v811_v20, 4 }
 0x32c   : > { %v799_v25 = vadd.f32 %v798_v21, %v797_v16  ;;  %1635 = vrcp.f32 %v808_v22  ;;  %v1609_v21 = vld [vmem:[%s1880_s18 + $0x8] sm:$0xff]   ;;  %v1610_v22 = vld [vmem:[%s1880_s18] sm:$0xff]  }
 0x32d   : > { %v823_v26 = vrot.slane %v822_v23, 2  ;;  %v813_v27 = vadd.f32 %v812_v24, %v811_v20 }
 0x32e   : > { %1637 = vrcp.f32 %v799_v25 }
 0x32f   : > { %v824_v31 = vadd.f32 %v823_v26, %v822_v23  ;;  %v814_v32 = vrot.slane %v813_v27, 2 }
 0x331   : > { %v815_v33 = vadd.f32 %v814_v32, %v813_v27  ;;  %v825_v35 = vrot.slane %v824_v31, 1  ;;  %v1000_v32 = vsub.s32 6, %v1920_v28 }
 0x333   : > { %v816_v36 = vrot.slane %v815_v33, 1  ;;  %v826_v37 = vadd.f32 %v825_v35, %v824_v31 }
 0x335   : > { %v817_v38 = vadd.f32 %v816_v36, %v815_v33  ;;  %1639 = vrcp.f32 %v826_v37  ;;  %v1001_v36 = vrot.slane %v1924_v30, %v1000_v32  ;;  %v1006_v37 = vsub.s32 7, %v1920_v28 }
 0x337   : > { %1641 = vrcp.f32 %v817_v38 }
 0x339   : > { %v1636_v39 = vpop.eup %1635 }
 0x33a   : > { %v833_v44 = vmul.f32 %v1636_v39, %v1620_v51  ;;  %v834_v45 = vmul.f32 %v1636_v39, %v1622_v52  ;;  %v1608_v51 = vld [vmem:[%s1875_s11 + $0x30] sm:$0xff]  }
 0x33b   : > { %v1638_v40 = vpop.eup %1637  ;;  %1499 = vmatpush3.bf16.msra.mxu1 %v1608_v51 }
 0x33c   : > { %v831_v41 = vmul.f32 %v1638_v40, %v1624_v54  ;;  %v832_v42 = vmul.f32 %v1638_v40, %v1626_v56  ;;  %v840_v46 = vpack.c.bf16 %v834_v45, %v833_v44  ;;  %1512 = vmatprep.subr.bf16.mxu1 %v1749_v18 }
 0x33e   : > { %v839_v43 = vpack.c.bf16 %v832_v42, %v831_v41  ;;  %v1007_v41 = vrot.slane %v1924_v30, %v1006_v37  ;;  %v1614_v30 = vld [vmem:[%s1885_s19] sm:$0xff]  }
 0x340   : > { %843 = vxpose.xlu0.c.b16.start [1/4] (short) (narrow) %v839_v43, 16 }
 0x342   : > { %v1640_v47 = vpop.eup %1639 }
 0x343   : > { %v837_v55 = vmul.f32 %v1640_v47, %v1628_v0  ;;  %v838_v57 = vmul.f32 %v1640_v47, %v1630_v6  ;;  %v1612_v47 = vld [vmem:[%s1885_s19 + $0x10] sm:$0xff]  }
 0x344   : > { %v1642_v48 = vpop.eup %1641  ;;  %844 = vxpose.xlu0.c.b16.cont [2/4] (short) (narrow) %v840_v46, 16  ;;  %v1611_v46 = vld [vmem:[%s1885_s19 + $0x18] sm:$0xff]  }
 0x345   : > { %v835_v49 = vmul.f32 %v1642_v48, %v1632_v8  ;;  %v836_v50 = vmul.f32 %v1642_v48, %v1634_v12  ;;  %v842_v58 = vpack.c.bf16 %v838_v57, %v837_v55  ;;  %v1613_v48 = vld [vmem:[%s1885_s19 + $0x8] sm:$0xff]  }
 0x347   : > { %v841_v53 = vpack.c.bf16 %v836_v50, %v835_v49  ;;  %v385_v49 = vld [vmem:[%s1890_s9 + $0x8] sm:$0x3] }
 0x348   : > { %v1018_v50 = vrot.slane %v385_v49, %v422_v34  ;;  %v1167_v34 = vrot.slane %v385_v49, %v416_v29 }
 0x349   : > { %845 = vxpose.xlu0.c.b16.cont [3/4] (short) (narrow) %v841_v53, 16 }
 0x34d   : > { %846 = vxpose.xlu0.c.b16.end [4/4] (short) (narrow) %v842_v58, 16 }
 0x3a3   : > { %v851_v54 = vpop.trf.xlu0 }
 0x3a4   : > { %1493 = vmatmul.mubr.msk.bf16.vlgmr.msra.gmra.mxu0 %vm859_vm4, %v851_v54 }
 0x3a5   : > { %1508 = vmatprep.mubr.msk.bf16.mxu0 %vm1750_vm2, %v1749_v18  ;;  %1505 = vmatpush3.bf16.msra.mxu0 %v1609_v21 }
 0x3a6   : > { %1506 = vmatprep.subr.bf16.mxu0 %v1749_v18 }
 0x3a9   : > { %1507 = vmatpush3.bf16.msra.mxu0 %v1610_v22 }
 0x464   : > { %v897_v52 = vpop.f32.mrf.mxu0 }
 0x466   : > { %v1494_v56 = vpop.f32.mrf.mxu0 }
 0x468   : > { %v900_v59 = vpop.f32.mrf.mxu0 }
 0x469   : > { %v904_v60 = vpack.c.bf16 %v900_v59, %v897_v52 }
 0x46a   : > { %v1495_v61 = vpop.f32.mrf.mxu0 }
 0x46b   : > { %1501 = vmatmul.mubr.msk.bf16.vlgmr.msra.gmra.mxu1 %vm386_vm1, %v904_v60 }
 0x46c   : > { %1520 = vmatprep.mubr.msk.bf16.mxu1 %vm1750_vm2, %v1749_v18  ;;  %1513 = vmatpush3.bf16.msra.mxu1 %v1611_v46 }
 0x46d   : > { %1514 = vmatprep.subr.bf16.mxu1 %v1749_v18 }
 0x470   : > { %1515 = vmatpush3.bf16.msra.mxu1 %v1612_v47 }
 0x471   : > { %1516 = vmatprep.subr.bf16.mxu1 %v1749_v18 }
 0x474   : > { %1517 = vmatpush3.bf16.msra.mxu1 %v1613_v48 }
 0x475   : > { %1518 = vmatprep.subr.bf16.mxu1 %v1749_v18 }
 0x478   : > { %1519 = vmatpush3.bf16.msra.mxu1 %v1614_v30 }
 0x52b   : > { %v963_v0 = vpop.f32.mrf.mxu1 }
 0x52c   : > { %v964_v1 = vadd.f32 %v963_v0, %v913_v63 }
 0x52d   : > { %v1502_v4 = vpop.f32.mrf.mxu1 }
 0x52e   : > { %v2016_v5 = vadd.f32 %v964_v1, %v1895_v2 }
 0x52f   : > { %v966_v6 = vpop.f32.mrf.mxu1 }
 0x530   : > { %v967_v7 = vadd.f32 %v966_v6, %v913_v63  ;;  %v972_v8 = vsel %vm386_vm1, %v2016_v5, 0.0 }
 0x531   : > { %973 = vadd.xlane.f32.xlu1 %v972_v8  ;;  %v1503_v9 = vpop.f32.mrf.mxu1 }
 0x532   : > { %v2021_v10 = vadd.f32 %v967_v7, %v1897_v3 }
 0x534   : > { %v975_v11 = vsel %vm386_vm1, %v2021_v10, 0.0 }
 0x535   : > { %976 = vadd.xlane.f32.xlu1 %v975_v11 }
 0x5ba   : > { %v974_v12 = vpop.xlane.xlu1 %973 }
 0x5bb   : > { %v978_v13 = vmul.f32 0.03125, %v974_v12 }
 0x5bd   : > { %v980_v2 = vsub.f32 %v2016_v5, %v978_v13 }
 0x5be   : > { %v977_v14 = vpop.xlane.xlu1 %976 }
 0x5bf   : > { %v979_v15 = vmul.f32 0.03125, %v977_v14  ;;  %v982_v16 = vmul.f32 %v980_v2, %v980_v2 }
 0x5c1   : > { %v981_v17 = vsub.f32 %v2021_v10, %v979_v15  ;;  %v984_v19 = vsel %vm386_vm1, %v982_v16, 0.0 }
 0x5c2   : > { %985 = vadd.xlane.f32.xlu1 %v984_v19 }
 0x5c3   : > { %v983_v20 = vmul.f32 %v981_v17, %v981_v17 }
 0x5c5   : > { %v987_v3 = vsel %vm386_vm1, %v983_v20, 0.0 }
 0x5c6   : > { %988 = vadd.xlane.f32.xlu1 %v987_v3 }
 0x64b   : > { %v986_v23 = vpop.xlane.xlu1 %985 }
 0x64c   : > { %v990_v24 = vmul.f32 0.03125, %v986_v23 }
 0x64e   : > { %v992_v25 = vadd.f32 1e-05, %v990_v24 }
 0x64f   : > { %v989_v26 = vpop.xlane.xlu1 %988 }
 0x650   : > { %1643 = vrsqrt.f32 %v992_v25  ;;  %v991_v27 = vmul.f32 0.03125, %v989_v26 }
 0x652   : > { %v993_v31 = vadd.f32 1e-05, %v991_v27 }
 0x654   : > { %1645 = vrsqrt.f32 %v993_v31 }
 0x65d   : > { %v1644_v33 = vpop.eup %1643 }
 0x65e   : > { %v996_v35 = vmul.f32 %v1644_v33, %v980_v2 }
 0x660   : > { %v1002_v40 = vmul.f32 %v1001_v36, %v996_v35 }
 0x661   : > { %v1646_v38 = vpop.eup %1645 }
 0x662   : > { %v997_v39 = vmul.f32 %v1646_v38, %v981_v17  ;;  %v1008_v43 = vadd.f32 %v1007_v41, %v1002_v40 }
 0x664   : > { %v1003_v42 = vmul.f32 %v1001_v36, %v997_v39 }
 0x666   : > { %v1009_v44 = vadd.f32 %v1007_v41, %v1003_v42 }
 0x668   : > { %v1010_v45 = vpack.c.bf16 %v1009_v44, %v1008_v43 }
 0x66a   : > { %1509 = vmatmul.mubr.msk.bf16.vlgmr.msra.gmra.mxu0 %vm386_vm1, %v1010_v45 }
 0x72a   : > { %v1068_v53 = vpop.f32.mrf.mxu0 }
 0x72b   : > { %v1069_v55 = vadd.f32 %v1068_v53, %v1018_v50 }
 0x72c   : > { %v1510_v57 = vpop.f32.mrf.mxu0 }
 0x72d   : > { %v1077_v58 = vmul.f32 0.70710677, %v1069_v55  ;;  %v1075_v18 = vmul.f32 0.5, %v1069_v55 }
 0x72e   : > { %v1071_v54 = vpop.f32.mrf.mxu0 }
 0x72f   : > { %1647 = verf.f32 %v1077_v58  ;;  %v1072_v51 = vadd.f32 %v1071_v54, %v1018_v50 }
 0x730   : > { %v1511_v52 = vpop.f32.mrf.mxu0 }
 0x731   : > { %v1078_v56 = vmul.f32 0.70710677, %v1072_v51  ;;  %v1076_v62 = vmul.f32 0.5, %v1072_v51 }
 0x733   : > { %1649 = verf.f32 %v1078_v56 }
 0x73c   : > { %v1648_v59 = vpop.eup %1647 }
 0x73d   : > { %v1081_v60 = vadd.f32 1.0, %v1648_v59 }
 0x73f   : > { %v1083_v0 = vmul.f32 %v1081_v60, %v1075_v18 }
 0x740   : > { %v1650_v61 = vpop.eup %1649 }
 0x741   : > { %v1082_v63 = vadd.f32 1.0, %v1650_v61 }
 0x743   : > { %v1084_v1 = vmul.f32 %v1082_v63, %v1076_v62 }
 0x745   : > { %v1085_v4 = vpack.c.bf16 %v1084_v1, %v1083_v0 }
 0x747   : > { %1521 = vmatmul.mubr.msk.bf16.vlgmr.msra.gmra.mxu1 %vm859_vm4, %v1085_v4 }
 0x807   : > { %v1155_v6 = vpop.f32.mrf.mxu1 }
 0x808   : > { %v1162_v7 = vadd.f32 %v1155_v6, %v2016_v5 }
 0x809   : > { %v1522_v8 = vpop.f32.mrf.mxu1 }
 0x80a   : > { %v1168_v9 = vadd.f32 %v1167_v34, %v1162_v7 }
 0x80b   : > { %v1158_v11 = vpop.f32.mrf.mxu1 }
 0x80c   : > { %1170 = vst.msk [vmem:[#allocation2] sm:$0xff] %vm386_vm1, %v1168_v9  ;;  %v1163_v12 = vadd.f32 %v1158_v11, %v2021_v10  ;;  %1175 = sbr.rel (%p1407_p1) target bundleno = 2378 (0x94a), region = 56 }
 0x80d   : > { %v1523_v13 = vpop.f32.mrf.mxu1 }
 0x80e   : > { %v1169_v2 = vadd.f32 %v1167_v34, %v1163_v12 }
 0x810   : > { %1171 = vst.msk [vmem:[#allocation2 + $0x8] sm:$0xff] %vm386_vm1, %v1169_v2 }
 0x811   : > { %v1178_v28 = vsel %vm386_vm1, %v1168_v9, 0.0  ;;  %v1181_v29 = vsel %vm386_vm1, %v1169_v2, 0.0  ;;  %v1408_v32 = vld [vmem:[%s2137_s6] ss:$0 sm:$0xff]  ;;  %v1409_v35 = vld [vmem:[%s2137_s6 + $0x1] ss:$0 sm:$0xff] }
 0x812   : > { %1179 = vadd.xlane.f32.xlu0 %v1178_v28 }
 0x816   : > { %1182 = vadd.xlane.f32.xlu0 %v1181_v29 }
 0x89b   : > { %v1180_v5 = vpop.xlane.xlu0 %1179 }
 0x89c   : > { %v1184_v14 = vmul.f32 0.03125, %v1180_v5 }
 0x89e   : > { %v1186_v15 = vsub.f32 %v1168_v9, %v1184_v14 }
 0x89f   : > { %v1183_v16 = vpop.xlane.xlu0 %1182 }
 0x8a0   : > { %v1185_v17 = vmul.f32 0.03125, %v1183_v16  ;;  %v1188_v19 = vmul.f32 %v1186_v15, %v1186_v15 }
 0x8a2   : > { %v1187_v10 = vsub.f32 %v1169_v2, %v1185_v17  ;;  %v1190_v20 = vsel %vm386_vm1, %v1188_v19, 0.0 }
 0x8a3   : > { %1191 = vadd.xlane.f32.xlu1 %v1190_v20 }
 0x8a4   : > { %v1189_v3 = vmul.f32 %v1187_v10, %v1187_v10 }
 0x8a6   : > { %v1193_v21 = vsel %vm386_vm1, %v1189_v3, 0.0 }
 0x8a7   : > { %1194 = vadd.xlane.f32.xlu1 %v1193_v21 }
 0x92c   : > { %v1192_v22 = vpop.xlane.xlu1 %1191 }
 0x92d   : > { %v1196_v23 = vmul.f32 0.03125, %v1192_v22 }
 0x92f   : > { %v1198_v24 = vadd.f32 1e-05, %v1196_v23 }
 0x930   : > { %v1195_v25 = vpop.xlane.xlu1 %1194 }
 0x931   : > { %1651 = vrsqrt.f32 %v1198_v24  ;;  %v1197_v26 = vmul.f32 0.03125, %v1195_v25 }
 0x933   : > { %v1199_v27 = vadd.f32 1e-05, %v1197_v26 }
 0x935   : > { %1653 = vrsqrt.f32 %v1199_v27 }
 0x93e   : > { %v1652_v31 = vpop.eup %1651 }
 0x93f   : > { %v1202_v33 = vmul.f32 %v1652_v31, %v1186_v15 }
 0x941   : > { %v1208_v36 = vmul.f32 %v1408_v32, %v1202_v33 }
 0x942   : > { %v1654_v37 = vpop.eup %1653 }
 0x943   : > { %v1214_v38 = vadd.f32 %v1409_v35, %v1208_v36  ;;  %v1203_v39 = vmul.f32 %v1654_v37, %v1187_v10 }
 0x945   : > { %1216 = vst.msk [vmem:[%s1892_s12] sm:$0xff] %vm386_vm1, %v1214_v38  ;;  %v1209_v40 = vmul.f32 %v1408_v32, %v1203_v39 }
 0x947   : > { %v1215_v41 = vadd.f32 %v1409_v35, %v1209_v40 }
 0x949   : > { %1217 = vst.msk [vmem:[%s1892_s12 + $0x8] sm:$0xff] %vm386_vm1, %v1215_v41 }
 0x94a PF: > { %s1419_s9 = sshll.u32 %s1735_s28, 8  ;;  %s1232_s20 = sshll.u32 %s1892_s12, 4  ;;  %s2076_s20 = int_to_ptr.vmem [resolvable:$true] %s1232_s20 }
 0x94b   : > { %s2073_s17 = scalar_lea.hbm %s2138_s7, %s1419_s9  ;;  %s2156_s21 = sand.u32 1, %s1723_s25  }
 0x94c   : > { %s2080_s10 = scalar_lea.sflag [#allocation4], %s2156_s21  ;;  %s1655_s15 = scalar_lea.vmem %s2076_s20, 256 }
 0x94d   : > { %p1656_p2 = scmp.ne.s32.totalorder %s2076_s20, %s1655_s15  ;;  %s1751_s28 = smov [#allocation3]  }
 0x94e   : > { %s1659_s16 = sshll.u32 %s1751_s28, 4  ;;  %s1660_s16 = int_to_ptr.vmem [resolvable:$false] %s1659_s16 }
 0x94f   : > { %p1657_p4 = pnand %p1656_p2, %p1843_p3  ;;  %s1661_s23 = scalar_lea.vmem %s1660_s16, 512 }
 0x950   : > { %p1662_p6 = scmp.lt.s32.totalorder %s2076_s20, %s1660_s16  ;;  %p1663_p7 = scmp.lt.s32.totalorder %s1661_s23, %s1655_s15 }
 0x951   : > { %p1658_p5 = pneg %p1657_p4 }
 0x952   : > { %p1664_p8 = por %p1663_p7, %p1662_p6 }
 0x954   : > { %p1665_p10 = pnand %p1664_p8, %p1658_p5 }
 0x956   : > { %1668 = shalt.err (!%p1665_p10)
}
 0x957   : > { %s1669_s12 = scalar_lea.hbm %s2073_s17, 256  ;;  %s1673_s26 = scalar_lea.hbm %s2138_s7, 512 }
 0x958   : > { %p1670_p11 = scmp.ne.s32.totalorder %s2073_s17, %s1669_s12  ;;  %p1674_p0 = scmp.lt.s32.totalorder %s2073_s17, %s2138_s7 }
 0x959   : > { %p1675_p1 = scmp.lt.s32.totalorder %s1673_s26, %s1669_s12 }
 0x95a   : > { %p1671_p12 = pnand %p1670_p11, %p1843_p3 }
 0x95b   : > { %p1676_p2 = por %p1675_p1, %p1674_p0 }
 0x95c   : > { %p1672_p13 = pneg %p1671_p12 }
 0x95e   : > { %p1677_p4 = pnand %p1676_p2, %p1672_p13 }
 0x960   : > { %1680 = shalt.err (!%p1677_p4)
}
 0x961   : > { %s1752_s11 = smov 128   ;;  %s1753_s18 = smov 8  }
 0x962   : > { %1525 = dma.vmem_to_hbm [thread:$0]  (%p1843_p3), %s2076_s20, 256, %s2073_s17, %s2080_s10, %s1752_s11, %s1752_s11, %s1753_s18  }
 0x963 PF: > { %s2157_s19 = sld [smem:[#allocation6_spill]]  ;;  %p1531_p5 = scmp.ge.s32.totalorder %s1747_s8, 2 }
 0x965   : > { %p1528_p6 = pnand %p1531_p5, %p1853_p9 }
 0x967   : > { %p1529_p7 = pneg %p1528_p6 }
 0x969   : > { %s1247_s30 = sand.u32 1, %s2157_s19  }
 0x96a   : > { %s1248_s14 = scalar_lea.sflag [#allocation4], %s1247_s30 }
 0x96b   : > { %1714 = dma.done.wait (%p1529_p7), %s1248_s14, 256  }
 0x96c   : > { %1716 = vsyncadd (%p1529_p7), %s1248_s14, 4294967040  ;;  %s20_s8 = sadd.s32 1, %s1747_s8   ;;  %s2159_s21 = sld [smem:[#allocation7_spill]] }
 0x96d   : > { %p17_p8 = scmp.ge.s32.totalorder %s20_s8, 6   ;;  %s2160_s26 = sld [smem:[#allocation13_spill]] }
 0x96e   : > { %s2161_s27 = sld [smem:[#allocation8_spill]]  ;;  %s2165_s24 = smov %s1723_s25 }
 0x96f   : > { %s2162_s28 = sld [smem:[#allocation9_spill]]  ;;  %19 = sbr.rel (!%p17_p8) target bundleno = 5 (0x5), region = 106 }
 0x970   : > { %s2163_s29 = sld [smem:[#allocation10_spill]] }
 0x971   : > { %s2164_s30 = sld [smem:[#allocation11_spill]] }
 0x972   : > { %s2166_s25 = smov %s2159_s21 }
 0x974   :  { %1253 = vsyncpa [#allocation4], 1 }
 0x975   :  { %1255 = vsyncpa [#allocation4 + $0x1], 1 }

</bundles_post_ra>
